<compile_context>
chip_gen: v6e
topology: v6e:2x2x1
jax: 0.10.0
libtpu: 0.0.40
codegen_flags: <defaults>
</compile_context>

<pallas_src>
from functools import partial

import numpy as np
import jax
import jax.numpy as jnp
from jax import lax
from jax.experimental import pallas as pl
from jax.experimental.pallas import tpu as pltpu


EP_IN_PAD = 8      # pos (3) padded input channels for the edge predictor
FC_IN_PAD = 16     # 9 vertex coords + candidate prob + padding

_VMEM_LIMIT = 32 * 1024 * 1024   # conservative cap, fits v5e/v6e/v7x tilings


def _cparams(sem):
    return pltpu.CompilerParams(dimension_semantics=sem,
                                vmem_limit_bytes=_VMEM_LIMIT)


def _round_up(v, m):
    return ((v + m - 1) // m) * m


def _pick_tile(n, cands=(512, 256, 128)):
    for c in cands:
        if n % c == 0:
            return c
    return 128


# ----------------------------------------------------------------------------
# Pallas kernels
# ----------------------------------------------------------------------------
def point_sampler_kernel(a_ref, x_ref, w_ref, b_ref, wo_ref, scores_ref,
                         h_scr, acc_scr):
    """3-layer GCN, node-major, adjacency streamed over the contraction axis.

    grid = (num_layers, K_tiles); axis 0 = layer (sequential), axis 1 = K.
    a_ref:   [N_pad, tk]  bf16 column panel of the row-normalized adjacency
    x_ref:   [N_pad, ph]  f32 node features (cols >= 3 zero) - resident
    w_ref:   [1, ph, ph]  current layer weight (layer-0 rows >= 3 zero)
    b_ref:   [1, 1, ph]   current layer bias
    wo_ref:  [ph, 8]      score projection (col 0 real)
    scores_ref: [N_pad, 8] raw per-node scores (written at the last step)
    h_scr/acc_scr: [N_pad, ph] f32 hidden state / aggregation accumulator
    """
    f32 = jnp.float32
    bf16 = jnp.bfloat16
    l = pl.program_id(0)
    k = pl.program_id(1)
    nl = pl.num_programs(0)
    nk = pl.num_programs(1)
    tk = a_ref.shape[1]

    @pl.when((l == 0) & (k == 0))
    def _():
        h_scr[...] = x_ref[...]

    @pl.when(k == 0)
    def _():
        acc_scr[...] = jnp.zeros_like(acc_scr)

    off = pl.multiple_of(k * tk, tk)
    h_blk = h_scr[pl.ds(off, tk), :]                               # [tk, ph]
    acc_scr[...] += jnp.dot(a_ref[...], h_blk.astype(bf16),
                            preferred_element_type=f32)            # [N_pad, ph]

    @pl.when(k == nk - 1)
    def _():
        z = jnp.dot(acc_scr[...].astype(bf16), w_ref[0].astype(bf16),
                    preferred_element_type=f32) + b_ref[0]
        h_scr[...] = jnp.maximum(z, 0.0)

    @pl.when((k == nk - 1) & (l == nl - 1))
    def _():
        scores_ref[...] = jnp.dot(h_scr[...].astype(bf16),
                                  wo_ref[...].astype(bf16),
                                  preferred_element_type=f32)       # [N_pad, 8]


def edge_predictor_kernel(x_ref, kcm_ref, mask_ref, wq_ref, bq_ref, prob_ref):
    """Row-tiled attention-style adjacency probabilities.

    x_ref:  [tm, 8]       bf16 sampled positions (row tile)
    kcm_ref:[eh, M_pad]   bf16 channel-major keys (resident)
    mask_ref:[tm, M_pad]  bf16 subgraph connectivity mask (row tile)
    prob_ref:[tm, M_pad]  bf16 sigmoid(q k^T / sqrt(eh)) * mask
    """
    f32 = jnp.float32
    bf16 = jnp.bfloat16
    q = jnp.dot(x_ref[...], wq_ref[...].astype(bf16),
                preferred_element_type=f32) + bq_ref[...]           # [tm, eh]
    scale = float(kcm_ref.shape[0]) ** -0.5
    logits = jnp.dot(q.astype(bf16), kcm_ref[...],
                     preferred_element_type=f32) * scale            # [tm, M_pad]
    logits = jnp.clip(logits, -30.0, 30.0)
    e = jnp.exp(-logits)
    sig = pl.reciprocal(1.0 + e, approx=True)
    prob_ref[...] = (sig * mask_ref[...].astype(f32)).astype(prob_ref.dtype)


def face_classifier_kernel(x_ref, w1, b1, w2, b2, w3, b3, logit_ref):
    """Lane-tiled 2-hidden-layer MLP over candidate faces (channel-major).

    x_ref: [16, tt] bf16: rows 0-8 vertex coords, row 9 candidate prob,
    rows 10-15 zero.  logit_ref: [1, tt] f32 raw face logits.
    """
    f32 = jnp.float32
    bf16 = jnp.bfloat16
    x = x_ref[...]                                                  # [16, tt]
    h = jnp.dot(w1[...].astype(bf16), x, preferred_element_type=f32)
    h = jnp.maximum(h + b1[...], 0.0)
    h = jnp.dot(w2[...].astype(bf16), h.astype(bf16),
                preferred_element_type=f32)
    h = jnp.maximum(h + b2[...], 0.0)
    z = jnp.dot(w3[...].astype(bf16), h.astype(bf16),
                preferred_element_type=f32)                         # [8, tt]
    logit_ref[...] = z[0:1, :] + b3[...]


# ----------------------------------------------------------------------------
# Single jitted device path (one host sync at the end of forward())
# ----------------------------------------------------------------------------
@partial(jax.jit, static_argnames=("ratio", "k_cfg"))
def _device_forward(params, pos, edge_index, *, ratio, k_cfg):
    f32 = jnp.float32
    bf16 = jnp.bfloat16
    pos = pos.astype(f32)
    num_nodes = pos.shape[0]
    n_pad = _round_up(num_nodes, 128)
    ph = params["ps_w"].shape[-1]
    eh = params["ep_wq"].shape[-1]
    fh = params["fc_w1t"].shape[0]

    # ---- padded bf16 adjacency + row-normalized A_norm (one fused pass) ----
    rows = jnp.concatenate([edge_index[0], edge_index[1]])
    cols = jnp.concatenate([edge_index[1], edge_index[0]])
    a = jnp.zeros((n_pad, n_pad), bf16).at[rows, cols].set(1.0)     # symmetric
    iota = jnp.arange(n_pad)
    eye_mask = iota[:, None] == iota[None, :]
    diag_val = (iota < num_nodes).astype(bf16)
    a_hat = jnp.where(eye_mask, diag_val[:, None], a)               # +I, no self loops
    deg = jnp.sum(a_hat, axis=1, dtype=f32)
    inv_deg = 1.0 / jnp.maximum(deg, 1.0)
    a_norm = (a_hat.astype(f32) * inv_deg[:, None]).astype(bf16)    # D^-1 A_hat

    # ---- point sampler: K-streamed GCN ----
    x_nm = jnp.zeros((n_pad, ph), f32).at[:num_nodes, :3].set(pos)
    tk = _pick_tile(n_pad)
    nk = n_pad // tk
    scores = pl.pallas_call(
        point_sampler_kernel,
        out_shape=jax.ShapeDtypeStruct((n_pad, 8), f32),
        grid=(3, nk),
        in_specs=[
            pl.BlockSpec((n_pad, tk), lambda l, k: (0, k)),
            pl.BlockSpec((n_pad, ph), lambda l, k: (0, 0)),
            pl.BlockSpec((1, ph, ph), lambda l, k: (l, 0, 0)),
            pl.BlockSpec((1, 1, ph), lambda l, k: (l, 0, 0)),
            pl.BlockSpec((ph, 8), lambda l, k: (0, 0)),
        ],
        out_specs=pl.BlockSpec((n_pad, 8), lambda l, k: (0, 0)),
        scratch_shapes=[pltpu.VMEM((n_pad, ph), jnp.float32),
                        pltpu.VMEM((n_pad, ph), jnp.float32)],
        compiler_params=_cparams(("arbitrary", "arbitrary")),
    )(a_norm, x_nm, params["ps_w"], params["ps_b"], params["ps_wo"])

    node_scores = scores[:num_nodes, 0] + params["ps_bo"][0, 0]
    sampled_probs = jax.nn.softmax(node_scores)                     # [N]

    target_nodes = min(max(int((1.0 - ratio) * num_nodes), 1), num_nodes)
    _, sampled_indices = lax.top_k(sampled_probs, target_nodes)
    sampled_pos = pos[sampled_indices]                              # [M, 3]
    m = target_nodes
    m_pad = _round_up(m, 128)

    # relabeled subgraph connectivity mask (torch_geometric.utils.subgraph)
    sub_mask = (a[sampled_indices][:, sampled_indices]
                * (1.0 - jnp.eye(m, dtype=bf16)))

    # ---- edge predictor (row-tiled, bf16 mask/output, channel-major K) ----
    xs_rows = jnp.zeros((m_pad, EP_IN_PAD), f32).at[:m, :3].set(sampled_pos)
    k_cm = (xs_rows @ params["ep_wk"] + params["ep_bk"]).T.astype(bf16)
    x_ep = xs_rows.astype(bf16)
    mask_pad = jnp.zeros((m_pad, m_pad), bf16).at[:m, :m].set(sub_mask)

    tm = _pick_tile(m_pad, (256, 128))
    adj_prob_pad = pl.pallas_call(
        edge_predictor_kernel,
        out_shape=jax.ShapeDtypeStruct((m_pad, m_pad), jnp.bfloat16),
        grid=(m_pad // tm,),
        in_specs=[
            pl.BlockSpec((tm, EP_IN_PAD), lambda i: (i, 0)),
            pl.BlockSpec((eh, m_pad), lambda i: (0, 0)),
            pl.BlockSpec((tm, m_pad), lambda i: (i, 0)),
            pl.BlockSpec((EP_IN_PAD, eh), lambda i: (0, 0)),
            pl.BlockSpec((1, eh), lambda i: (0, 0)),
        ],
        out_specs=pl.BlockSpec((tm, m_pad), lambda i: (i, 0)),
        compiler_params=_cparams(("parallel",)),
    )(x_ep, k_cm, mask_pad, params["ep_wq"], params["ep_bq"])
    adj_prob = adj_prob_pad[:m, :m].astype(f32)                     # [M, M]

    ii, jj = jnp.meshgrid(jnp.arange(m), jnp.arange(m), indexing="ij")
    adj_edge_index = jnp.stack([ii.ravel(), jj.ravel()])
    adj_edge_prob = adj_prob.ravel()

    # ---- candidate faces (static enumeration + validity mask) ----
    k_face = min(k_cfg, m - 1)
    ju, jv = np.triu_indices(k_face, 1)
    n_pairs = len(ju)
    t = m * n_pairs

    out = {
        "sampled_indices": sampled_indices,
        "sampled_probs": sampled_probs,
        "sampled_pos": sampled_pos,
        "adj_edge_index": adj_edge_index,
        "adj_edge_prob": adj_edge_prob,
    }

    if t == 0:  # static (trace-time) degenerate case
        out.update({
            "candidate_faces": jnp.zeros((0, 3), jnp.int32),
            "candidate_probs": jnp.zeros((0,), f32),
            "face_probs": jnp.zeros((0,), f32),
            "keep": jnp.zeros((0,), jnp.bool_),
        })
        return out

    _, knn_idx = lax.top_k(adj_prob, k_face)                        # [M, k]
    i_idx = jnp.repeat(jnp.arange(m), n_pairs)
    n1 = knn_idx[:, ju].reshape(-1)
    n2 = knn_idx[:, jv].reshape(-1)
    candidate_faces = jnp.stack([i_idx, n1, n2], axis=1)            # [T, 3]
    p_in1 = adj_prob[i_idx, n1]
    p_in2 = adj_prob[i_idx, n2]
    p_n12 = adj_prob[n1, n2]
    valid = ((p_n12 > 0) & (p_in1 > 0) & (p_in2 > 0)
             & (n1 != i_idx) & (n2 != i_idx) & (n1 != n2))
    valid_f = valid.astype(f32)
    candidate_probs = p_in1 * p_in2 * p_n12 * (valid_f / 3.0)       # [T]

    # ---- face classifier (lane-tiled MLP, softmax in XLA) ----
    t_pad = _round_up(t, 128)
    tt = _pick_tile(t_pad)
    face_pos = sampled_pos[candidate_faces]                         # [T, 3, 3]
    feat = jnp.zeros((FC_IN_PAD, t_pad), bf16)
    feat = feat.at[:9, :t].set(face_pos.reshape(t, 9).T.astype(bf16))
    feat = feat.at[9, :t].set(candidate_probs.astype(bf16))

    logit_row = pl.pallas_call(
        face_classifier_kernel,
        out_shape=jax.ShapeDtypeStruct((1, t_pad), f32),
        grid=(t_pad // tt,),
        in_specs=[
            pl.BlockSpec((FC_IN_PAD, tt), lambda j: (0, j)),
            pl.BlockSpec((fh, FC_IN_PAD), lambda j: (0, 0)),
            pl.BlockSpec((fh, 1), lambda j: (0, 0)),
            pl.BlockSpec((fh, fh), lambda j: (0, 0)),
            pl.BlockSpec((fh, 1), lambda j: (0, 0)),
            pl.BlockSpec((8, fh), lambda j: (0, 0)),
            pl.BlockSpec((1, 1), lambda j: (0, 0)),
        ],
        out_specs=pl.BlockSpec((1, tt), lambda j: (0, j)),
        compiler_params=_cparams(("parallel",)),
    )(feat, params["fc_w1t"], params["fc_b1"], params["fc_w2t"],
      params["fc_b2"], params["fc_w3t"], params["fc_b3"])

    face_logits = logit_row[0, :t]
    masked_logits = jnp.where(valid, face_logits, -1e30)
    mx = jnp.max(masked_logits)
    e = jnp.exp(masked_logits - mx) * valid_f
    face_probs = e / jnp.maximum(jnp.sum(e), 1e-20)

    # ---- threshold / keep mask (dynamic-shape compaction stays on host) ----
    fp_nan = jnp.where(valid, face_probs, jnp.nan)
    threshold = jnp.nanquantile(fp_nan, 1.0 - ratio)
    keep = (face_probs > threshold) & valid

    out.update({
        "candidate_faces": candidate_faces,
        "candidate_probs": candidate_probs,
        "face_probs": face_probs,
        "keep": keep,
    })
    return out


# ----------------------------------------------------------------------------
# Model
# ----------------------------------------------------------------------------
class MeshSimplifier:
    EP_IN_PAD = EP_IN_PAD
    FC_IN_PAD = FC_IN_PAD

    def __init__(self, point_sampler_in_channels, point_sampler_out_channels,
                 point_sampler_num_layers, edge_predictor_in_channels,
                 edge_predictor_hidden_channels, edge_predictor_k,
                 face_classifier_in_channels, face_classifier_hidden_channels,
                 face_classifier_num_layers, face_classifier_k, ratio, key):
        assert point_sampler_num_layers == 3, "kernel is specialized to 3 GCN layers"
        # TODO(synk): edge_predictor_k and face_classifier_num_layers are part
        # of the original hyper-params but the kernels use a fixed subgraph
        # mask / 2 hidden layers.
        self.ratio = float(ratio)
        self.k = int(face_classifier_k)
        ph = int(point_sampler_out_channels)
        eh = int(edge_predictor_hidden_channels)
        fh = int(face_classifier_hidden_channels)
        assert ph % 8 == 0 and eh % 8 == 0 and fh % 8 == 0

        ks = jax.random.split(key, 12)

        def w(k_, shape, scale=0.2):
            return scale * jax.random.normal(k_, shape, jnp.float32)

        # GCN weights are node-major [in, out]; layer-0 rows >= 3 are zero.
        w0 = jnp.zeros((ph, ph), jnp.float32).at[:3, :].set(w(ks[0], (3, ph)))
        ps_w = jnp.stack([w0, w(ks[1], (ph, ph)), w(ks[2], (ph, ph))])
        ps_wo = jnp.zeros((ph, 8), jnp.float32).at[:, 0].set(w(ks[3], (ph,)))

        self.params = {
            "ps_w": ps_w,                                   # [3, ph, ph]
            "ps_b": jnp.zeros((3, 1, ph), jnp.float32),
            "ps_wo": ps_wo,                                 # [ph, 8] (col 0 real)
            "ps_bo": jnp.zeros((1, 1), jnp.float32),
            "ep_wq": w(ks[4], (self.EP_IN_PAD, eh)),
            "ep_bq": jnp.zeros((1, eh), jnp.float32),
            "ep_wk": w(ks[5], (self.EP_IN_PAD, eh)),
            "ep_bk": jnp.zeros((1, eh), jnp.float32),
            "fc_w1t": w(ks[6], (fh, self.FC_IN_PAD)),
            "fc_b1": jnp.zeros((fh, 1), jnp.float32),
            "fc_w2t": w(ks[7], (fh, fh)),
            "fc_b2": jnp.zeros((fh, 1), jnp.float32),
            "fc_w3t": w(ks[8], (8, fh)),                    # row 0 = face logit
            "fc_b3": jnp.zeros((1, 1), jnp.float32),
        }

    def forward(self, pos, edge_index):
        dev = _device_forward(self.params, pos, edge_index,
                              ratio=self.ratio, k_cfg=self.k)
        out = dict(dev)
        # single device -> host sync; dynamic-shape boolean compaction on host
        keep = np.asarray(out.pop("keep"))
        cand_np = np.asarray(out["candidate_faces"])
        if keep.size and keep.any():
            out["simplified_faces"] = cand_np[keep]
        else:
            out["simplified_faces"] = np.zeros((0, 3), dtype=np.int32)
        return out


# ----------------------------------------------------------------------------
if __name__ == "__main__":
    key = jax.random.PRNGKey(0)
    k_pos, k_param = jax.random.split(key)

    num_nodes = 64
    pos = jax.random.uniform(k_pos, (num_nodes, 3), jnp.float32)

    # build a deterministic k-NN mesh connectivity as the input graph
    k_graph = 8
    d2 = jnp.sum((pos[:, None, :] - pos[None, :, :]) ** 2, axis=-1)
    d2 = d2 + jnp.eye(num_nodes) * 1e9
    _, nbr = jax.lax.top_k(-d2, k_graph)
    src = jnp.repeat(jnp.arange(num_nodes), k_graph)
    dst = nbr.reshape(-1)
    edge_index = jnp.stack([jnp.concatenate([src, dst]),
                            jnp.concatenate([dst, src])])

    model = MeshSimplifier(
        point_sampler_in_channels=3, point_sampler_out_channels=32,
        point_sampler_num_layers=3,
        edge_predictor_in_channels=3, edge_predictor_hidden_channels=32,
        edge_predictor_k=15,
        face_classifier_in_channels=3, face_classifier_hidden_channels=32,
        face_classifier_num_layers=2, face_classifier_k=8,
        ratio=0.5, key=k_param)

    out = model.forward(pos, edge_index)

    jax.block_until_ready(out["sampled_probs"])
    jax.block_until_ready(out["adj_edge_prob"])
    jax.block_until_ready(out["candidate_probs"])
    jax.block_until_ready(out["face_probs"])
    print("KERNEL_OK")
</pallas_src>

<mosaic_0001>
module attributes {stable_mosaic.version = 11 : i64} {
  func.func @point_sampler_kernel(%arg0: i32, %arg1: i32, %arg2: memref<128x128xbf16, #tpu.memory_space<vmem>>, %arg3: memref<128x32xf32, #tpu.memory_space<vmem>>, %arg4: memref<1x32x32xf32, #tpu.memory_space<vmem>>, %arg5: memref<1x1x32xf32, #tpu.memory_space<vmem>>, %arg6: memref<32x8xf32, #tpu.memory_space<vmem>>, %arg7: memref<128x8xf32, #tpu.memory_space<vmem>>, %arg8: memref<128x32xf32, #tpu.memory_space<vmem>>, %arg9: memref<128x32xf32, #tpu.memory_space<vmem>>) attributes {dimension_semantics = [#tpu.dimension_semantics<arbitrary>, #tpu.dimension_semantics<arbitrary>], iteration_bounds = array<i64: 3, 1>, scalar_prefetch = 0 : i64, scratch_operands = 2 : i64, tpu.core_type = #tpu.core_type<tc>, window_params = [{transform_indices = @transform_0, window_bounds = array<i64: 128, 128>}, {pipeline_mode = #tpu.pipeline_mode<synchronous>, transform_indices = @transform_1, window_bounds = array<i64: 128, 32>}, {transform_indices = @transform_2, window_bounds = array<i64: 1, 32, 32>}, {transform_indices = @transform_3, window_bounds = array<i64: 1, 1, 32>}, {pipeline_mode = #tpu.pipeline_mode<synchronous>, transform_indices = @transform_4, window_bounds = array<i64: 32, 8>}, {pipeline_mode = #tpu.pipeline_mode<synchronous>, transform_indices = @transform_5, window_bounds = array<i64: 128, 8>}]} {
    %c0_i32 = arith.constant 0 : i32
    %0 = arith.cmpi eq, %arg0, %c0_i32 : i32
    %c0_i32_0 = arith.constant 0 : i32
    %1 = arith.cmpi eq, %arg1, %c0_i32_0 : i32
    %2 = arith.andi %0, %1 : i1
    %3 = arith.extui %2 : i1 to i32
    %c0_i32_1 = arith.constant 0 : i32
    %4 = arith.cmpi ne, %3, %c0_i32_1 : i32
    scf.if %4 {
      %c0_14 = arith.constant 0 : index
      %c0_15 = arith.constant 0 : index
      %26 = vector.load %arg3[%c0_14, %c0_15] : memref<128x32xf32, #tpu.memory_space<vmem>>, vector<128x32xf32>
      %c0_16 = arith.constant 0 : index
      %c0_17 = arith.constant 0 : index
      %27 = vector.load %arg8[%c0_16, %c0_17] : memref<128x32xf32, #tpu.memory_space<vmem>>, vector<128x32xf32>
      tpu.vector_store %arg8[%c0_16, %c0_17], %26 {strides = array<i32>} : memref<128x32xf32, #tpu.memory_space<vmem>>, vector<128x32xf32>,
    } else {
    }
    %c0_i32_2 = arith.constant 0 : i32
    %5 = arith.cmpi eq, %arg1, %c0_i32_2 : i32
    %6 = arith.extui %5 : i1 to i32
    %c0_i32_3 = arith.constant 0 : i32
    %7 = arith.cmpi ne, %6, %c0_i32_3 : i32
    scf.if %7 {
      %cst_14 = arith.constant 0.000000e+00 : f32
      %26 = vector.broadcast %cst_14 : f32 to vector<128x32xf32>
      %c0_15 = arith.constant 0 : index
      %c0_16 = arith.constant 0 : index
      %27 = vector.load %arg9[%c0_15, %c0_16] : memref<128x32xf32, #tpu.memory_space<vmem>>, vector<128x32xf32>
      tpu.vector_store %arg9[%c0_15, %c0_16], %26 {strides = array<i32>} : memref<128x32xf32, #tpu.memory_space<vmem>>, vector<128x32xf32>,
    } else {
    }
    %c128_i32 = arith.constant 128 : i32
    %8 = arith.muli %arg1, %c128_i32 : i32
    %9 = tpu.assume_multiple %8, 128 : i32
    %10 = arith.index_cast %9 : i32 to index
    %c0 = arith.constant 0 : index
    %11 = vector.load %arg8[%10, %c0] : memref<128x32xf32, #tpu.memory_space<vmem>>, vector<128x32xf32>
    %c0_4 = arith.constant 0 : index
    %c0_5 = arith.constant 0 : index
    %12 = vector.load %arg9[%c0_4, %c0_5] : memref<128x32xf32, #tpu.memory_space<vmem>>, vector<128x32xf32>
    %c0_6 = arith.constant 0 : index
    %c0_7 = arith.constant 0 : index
    %13 = vector.load %arg2[%c0_6, %c0_7] : memref<128x128xbf16, #tpu.memory_space<vmem>>, vector<128x128xbf16>
    %14 = arith.truncf %11 : vector<128x32xf32> to vector<128x32xbf16>
    %cst = arith.constant dense<0.000000e+00> : vector<128x32xf32>
    %15 = tpu.matmul %13, %14, %cst {dimension_numbers = #tpu.dot_dimension_numbers<[1], [0], [0], [1], [0, 0, 1, 1], [], []>} : vector<128x128xbf16>, vector<128x32xbf16>, vector<128x32xf32> -> vector<128x32xf32>
    %16 = arith.addf %12, %15 : vector<128x32xf32>
    %c0_8 = arith.constant 0 : index
    %c0_9 = arith.constant 0 : index
    %17 = vector.load %arg9[%c0_8, %c0_9] : memref<128x32xf32, #tpu.memory_space<vmem>>, vector<128x32xf32>
    tpu.vector_store %arg9[%c0_8, %c0_9], %16 {strides = array<i32>} : memref<128x32xf32, #tpu.memory_space<vmem>>, vector<128x32xf32>,
    %c0_i32_10 = arith.constant 0 : i32
    %18 = arith.cmpi eq, %arg1, %c0_i32_10 : i32
    %19 = arith.extui %18 : i1 to i32
    %c0_i32_11 = arith.constant 0 : i32
    %20 = arith.cmpi ne, %19, %c0_i32_11 : i32
    scf.if %20 {
      %c0_14 = arith.constant 0 : index
      %c0_15 = arith.constant 0 : index
      %26 = vector.load %arg9[%c0_14, %c0_15] : memref<128x32xf32, #tpu.memory_space<vmem>>, vector<128x32xf32>
      %27 = arith.truncf %26 : vector<128x32xf32> to vector<128x32xbf16>
      %c0_16 = arith.constant 0 : index
      %c0_17 = arith.constant 0 : index
      %c0_18 = arith.constant 0 : index
      %28 = vector.load %arg4[%c0_16, %c0_17, %c0_18] : memref<1x32x32xf32, #tpu.memory_space<vmem>>, vector<1x32x32xf32>
      %29 = vector.shape_cast %28 : vector<1x32x32xf32> to vector<32x32xf32>
      %30 = arith.truncf %29 : vector<32x32xf32> to vector<32x32xbf16>
      %cst_19 = arith.constant dense<0.000000e+00> : vector<128x32xf32>
      %31 = tpu.matmul %27, %30, %cst_19 {dimension_numbers = #tpu.dot_dimension_numbers<[1], [0], [0], [1], [0, 0, 1, 1], [], []>} : vector<128x32xbf16>, vector<32x32xbf16>, vector<128x32xf32> -> vector<128x32xf32>
      %c0_20 = arith.constant 0 : index
      %c0_21 = arith.constant 0 : index
      %c0_22 = arith.constant 0 : index
      %32 = vector.load %arg5[%c0_20, %c0_21, %c0_22] : memref<1x1x32xf32, #tpu.memory_space<vmem>>, vector<1x1x32xf32>
      %33 = vector.shape_cast %32 : vector<1x1x32xf32> to vector<1x32xf32>
      %34 = vector.broadcast %33 : vector<1x32xf32> to vector<128x32xf32>
      %35 = arith.addf %31, %34 : vector<128x32xf32>
      %cst_23 = arith.constant 0.000000e+00 : f32
      %36 = vector.broadcast %cst_23 : f32 to vector<128x32xf32>
      %37 = arith.maximumf %35, %36 : vector<128x32xf32>
      %c0_24 = arith.constant 0 : index
      %c0_25 = arith.constant 0 : index
      %38 = vector.load %arg8[%c0_24, %c0_25] : memref<128x32xf32, #tpu.memory_space<vmem>>, vector<128x32xf32>
      tpu.vector_store %arg8[%c0_24, %c0_25], %37 {strides = array<i32>} : memref<128x32xf32, #tpu.memory_space<vmem>>, vector<128x32xf32>,
    } else {
    }
    %c0_i32_12 = arith.constant 0 : i32
    %21 = arith.cmpi eq, %arg1, %c0_i32_12 : i32
    %c2_i32 = arith.constant 2 : i32
    %22 = arith.cmpi eq, %arg0, %c2_i32 : i32
    %23 = arith.andi %21, %22 : i1
    %24 = arith.extui %23 : i1 to i32
    %c0_i32_13 = arith.constant 0 : i32
    %25 = arith.cmpi ne, %24, %c0_i32_13 : i32
    scf.if %25 {
      %c0_14 = arith.constant 0 : index
      %c0_15 = arith.constant 0 : index
      %26 = vector.load %arg8[%c0_14, %c0_15] : memref<128x32xf32, #tpu.memory_space<vmem>>, vector<128x32xf32>
      %27 = arith.truncf %26 : vector<128x32xf32> to vector<128x32xbf16>
      %c0_16 = arith.constant 0 : index
      %c0_17 = arith.constant 0 : index
      %28 = vector.load %arg6[%c0_16, %c0_17] : memref<32x8xf32, #tpu.memory_space<vmem>>, vector<32x8xf32>
      %29 = arith.truncf %28 : vector<32x8xf32> to vector<32x8xbf16>
      %cst_18 = arith.constant dense<0.000000e+00> : vector<128x8xf32>
      %30 = tpu.matmul %27, %29, %cst_18 {dimension_numbers = #tpu.dot_dimension_numbers<[1], [0], [0], [1], [0, 0, 1, 1], [], []>} : vector<128x32xbf16>, vector<32x8xbf16>, vector<128x8xf32> -> vector<128x8xf32>
      %c0_19 = arith.constant 0 : index
      %c0_20 = arith.constant 0 : index
      %31 = vector.load %arg7[%c0_19, %c0_20] : memref<128x8xf32, #tpu.memory_space<vmem>>, vector<128x8xf32>
      tpu.vector_store %arg7[%c0_19, %c0_20], %30 {strides = array<i32>} : memref<128x8xf32, #tpu.memory_space<vmem>>, vector<128x8xf32>,
    } else {
    }
    return
  }
  func.func @transform_0(%arg0: i32, %arg1: i32) -> (i32, i32) {
    %c0_i32 = arith.constant 0 : i32
    %c0_i32_0 = arith.constant 0 : i32
    return %c0_i32, %arg1 : i32, i32
  }
  func.func @transform_1(%arg0: i32, %arg1: i32) -> (i32, i32) {
    %c0_i32 = arith.constant 0 : i32
    %c0_i32_0 = arith.constant 0 : i32
    %c0_i32_1 = arith.constant 0 : i32
    return %c0_i32, %c0_i32_0 : i32, i32
  }
  func.func @transform_2(%arg0: i32, %arg1: i32) -> (i32, i32, i32) {
    %c0_i32 = arith.constant 0 : i32
    %c0_i32_0 = arith.constant 0 : i32
    %c0_i32_1 = arith.constant 0 : i32
    return %arg0, %c0_i32, %c0_i32_0 : i32, i32, i32
  }
  func.func @transform_3(%arg0: i32, %arg1: i32) -> (i32, i32, i32) {
    %c0_i32 = arith.constant 0 : i32
    %c0_i32_0 = arith.constant 0 : i32
    %c0_i32_1 = arith.constant 0 : i32
    return %arg0, %c0_i32, %c0_i32_0 : i32, i32, i32
  }
  func.func @transform_4(%arg0: i32, %arg1: i32) -> (i32, i32) {
    %c0_i32 = arith.constant 0 : i32
    %c0_i32_0 = arith.constant 0 : i32
    %c0_i32_1 = arith.constant 0 : i32
    return %c0_i32, %c0_i32_0 : i32, i32
  }
  func.func @transform_5(%arg0: i32, %arg1: i32) -> (i32, i32) {
    %c0_i32 = arith.constant 0 : i32
    %c0_i32_0 = arith.constant 0 : i32
    %c0_i32_1 = arith.constant 0 : i32
    return %c0_i32, %c0_i32_0 : i32, i32
  }
}

module attributes {stable_mosaic.version = 11 : i64} {
  func.func @edge_predictor_kernel(%arg0: i32, %arg1: memref<128x8xbf16, #tpu.memory_space<vmem>>, %arg2: memref<32x128xbf16, #tpu.memory_space<vmem>>, %arg3: memref<128x128xbf16, #tpu.memory_space<vmem>>, %arg4: memref<8x32xf32, #tpu.memory_space<vmem>>, %arg5: memref<1x32xf32, #tpu.memory_space<vmem>>, %arg6: memref<128x128xbf16, #tpu.memory_space<vmem>>) attributes {dimension_semantics = [#tpu.dimension_semantics<parallel>], iteration_bounds = array<i64: 1>, scalar_prefetch = 0 : i64, scratch_operands = 0 : i64, tpu.core_type = #tpu.core_type<tc>, window_params = [{transform_indices = @transform_0, window_bounds = array<i64: 128, 8>}, {pipeline_mode = #tpu.pipeline_mode<synchronous>, transform_indices = @transform_1, window_bounds = array<i64: 32, 128>}, {transform_indices = @transform_2, window_bounds = array<i64: 128, 128>}, {pipeline_mode = #tpu.pipeline_mode<synchronous>, transform_indices = @transform_3, window_bounds = array<i64: 8, 32>}, {pipeline_mode = #tpu.pipeline_mode<synchronous>, transform_indices = @transform_4, window_bounds = array<i64: 1, 32>}, {transform_indices = @transform_5, window_bounds = array<i64: 128, 128>}]} {
    %c0 = arith.constant 0 : index
    %c0_0 = arith.constant 0 : index
    %0 = vector.load %arg1[%c0, %c0_0] : memref<128x8xbf16, #tpu.memory_space<vmem>>, vector<128x8xbf16>
    %c0_1 = arith.constant 0 : index
    %c0_2 = arith.constant 0 : index
    %1 = vector.load %arg4[%c0_1, %c0_2] : memref<8x32xf32, #tpu.memory_space<vmem>>, vector<8x32xf32>
    %2 = arith.truncf %1 : vector<8x32xf32> to vector<8x32xbf16>
    %cst = arith.constant dense<0.000000e+00> : vector<128x32xf32>
    %3 = tpu.matmul %0, %2, %cst {dimension_numbers = #tpu.dot_dimension_numbers<[1], [0], [0], [1], [0, 0, 1, 1], [], []>} : vector<128x8xbf16>, vector<8x32xbf16>, vector<128x32xf32> -> vector<128x32xf32>
    %c0_3 = arith.constant 0 : index
    %c0_4 = arith.constant 0 : index
    %4 = vector.load %arg5[%c0_3, %c0_4] : memref<1x32xf32, #tpu.memory_space<vmem>>, vector<1x32xf32>
    %5 = vector.broadcast %4 : vector<1x32xf32> to vector<128x32xf32>
    %6 = arith.addf %3, %5 : vector<128x32xf32>
    %7 = arith.truncf %6 : vector<128x32xf32> to vector<128x32xbf16>
    %c0_5 = arith.constant 0 : index
    %c0_6 = arith.constant 0 : index
    %8 = vector.load %arg2[%c0_5, %c0_6] : memref<32x128xbf16, #tpu.memory_space<vmem>>, vector<32x128xbf16>
    %cst_7 = arith.constant dense<0.000000e+00> : vector<128x128xf32>
    %9 = tpu.matmul %7, %8, %cst_7 {dimension_numbers = #tpu.dot_dimension_numbers<[1], [0], [0], [1], [0, 0, 1, 1], [], []>} : vector<128x32xbf16>, vector<32x128xbf16>, vector<128x128xf32> -> vector<128x128xf32>
    %cst_8 = arith.constant 0.176776692 : f32
    %10 = vector.broadcast %cst_8 : f32 to vector<128x128xf32>
    %11 = arith.mulf %9, %10 : vector<128x128xf32>
    %cst_9 = arith.constant -3.000000e+01 : f32
    %cst_10 = arith.constant 3.000000e+01 : f32
    %12 = vector.broadcast %cst_9 : f32 to vector<128x128xf32>
    %13 = arith.maximumf %12, %11 : vector<128x128xf32>
    %14 = vector.broadcast %cst_10 : f32 to vector<128x128xf32>
    %15 = arith.minimumf %14, %13 : vector<128x128xf32>
    %cst_11 = arith.constant 0.000000e+00 : f32
    %16 = vector.broadcast %cst_11 : f32 to vector<128x128xf32>
    %17 = arith.subf %16, %15 : vector<128x128xf32>
    %18 = math.exp %17 : vector<128x128xf32>
    %cst_12 = arith.constant 1.000000e+00 : f32
    %19 = vector.broadcast %cst_12 : f32 to vector<128x128xf32>
    %20 = arith.addf %19, %18 : vector<128x128xf32>
    %21 = tpu.reciprocal %20 {approx = true} : vector<128x128xf32> -> vector<128x128xf32>
    %c0_13 = arith.constant 0 : index
    %c0_14 = arith.constant 0 : index
    %22 = vector.load %arg3[%c0_13, %c0_14] : memref<128x128xbf16, #tpu.memory_space<vmem>>, vector<128x128xbf16>
    %23 = arith.extf %22 : vector<128x128xbf16> to vector<128x128xf32>
    %24 = arith.mulf %21, %23 : vector<128x128xf32>
    %25 = arith.truncf %24 : vector<128x128xf32> to vector<128x128xbf16>
    %c0_15 = arith.constant 0 : index
    %c0_16 = arith.constant 0 : index
    %26 = vector.load %arg6[%c0_15, %c0_16] : memref<128x128xbf16, #tpu.memory_space<vmem>>, vector<128x128xbf16>
    tpu.vector_store %arg6[%c0_15, %c0_16], %25 {strides = array<i32>} : memref<128x128xbf16, #tpu.memory_space<vmem>>, vector<128x128xbf16>,
    return
  }
  func.func @transform_0(%arg0: i32) -> (i32, i32) {
    %c0_i32 = arith.constant 0 : i32
    %c0_i32_0 = arith.constant 0 : i32
    return %arg0, %c0_i32 : i32, i32
  }
  func.func @transform_1(%arg0: i32) -> (i32, i32) {
    %c0_i32 = arith.constant 0 : i32
    %c0_i32_0 = arith.constant 0 : i32
    %c0_i32_1 = arith.constant 0 : i32
    return %c0_i32, %c0_i32_0 : i32, i32
  }
  func.func @transform_2(%arg0: i32) -> (i32, i32) {
    %c0_i32 = arith.constant 0 : i32
    %c0_i32_0 = arith.constant 0 : i32
    return %arg0, %c0_i32 : i32, i32
  }
  func.func @transform_3(%arg0: i32) -> (i32, i32) {
    %c0_i32 = arith.constant 0 : i32
    %c0_i32_0 = arith.constant 0 : i32
    %c0_i32_1 = arith.constant 0 : i32
    return %c0_i32, %c0_i32_0 : i32, i32
  }
  func.func @transform_4(%arg0: i32) -> (i32, i32) {
    %c0_i32 = arith.constant 0 : i32
    %c0_i32_0 = arith.constant 0 : i32
    %c0_i32_1 = arith.constant 0 : i32
    return %c0_i32, %c0_i32_0 : i32, i32
  }
  func.func @transform_5(%arg0: i32) -> (i32, i32) {
    %c0_i32 = arith.constant 0 : i32
    %c0_i32_0 = arith.constant 0 : i32
    return %arg0, %c0_i32 : i32, i32
  }
}

module attributes {stable_mosaic.version = 11 : i64} {
  func.func @face_classifier_kernel(%arg0: i32, %arg1: memref<16x128xbf16, #tpu.memory_space<vmem>>, %arg2: memref<32x16xf32, #tpu.memory_space<vmem>>, %arg3: memref<32x1xf32, #tpu.memory_space<vmem>>, %arg4: memref<32x32xf32, #tpu.memory_space<vmem>>, %arg5: memref<32x1xf32, #tpu.memory_space<vmem>>, %arg6: memref<8x32xf32, #tpu.memory_space<vmem>>, %arg7: memref<1x1xf32, #tpu.memory_space<vmem>>, %arg8: memref<1x128xf32, #tpu.memory_space<vmem>>) attributes {dimension_semantics = [#tpu.dimension_semantics<parallel>], iteration_bounds = array<i64: 7>, scalar_prefetch = 0 : i64, scratch_operands = 0 : i64, tpu.core_type = #tpu.core_type<tc>, window_params = [{transform_indices = @transform_0, window_bounds = array<i64: 16, 128>}, {pipeline_mode = #tpu.pipeline_mode<synchronous>, transform_indices = @transform_1, window_bounds = array<i64: 32, 16>}, {pipeline_mode = #tpu.pipeline_mode<synchronous>, transform_indices = @transform_2, window_bounds = array<i64: 32, 1>}, {pipeline_mode = #tpu.pipeline_mode<synchronous>, transform_indices = @transform_3, window_bounds = array<i64: 32, 32>}, {pipeline_mode = #tpu.pipeline_mode<synchronous>, transform_indices = @transform_4, window_bounds = array<i64: 32, 1>}, {pipeline_mode = #tpu.pipeline_mode<synchronous>, transform_indices = @transform_5, window_bounds = array<i64: 8, 32>}, {pipeline_mode = #tpu.pipeline_mode<synchronous>, transform_indices = @transform_6, window_bounds = array<i64: 1, 1>}, {transform_indices = @transform_7, window_bounds = array<i64: 1, 128>}]} {
    %c0 = arith.constant 0 : index
    %c0_0 = arith.constant 0 : index
    %0 = vector.load %arg1[%c0, %c0_0] : memref<16x128xbf16, #tpu.memory_space<vmem>>, vector<16x128xbf16>
    %c0_1 = arith.constant 0 : index
    %c0_2 = arith.constant 0 : index
    %1 = vector.load %arg2[%c0_1, %c0_2] : memref<32x16xf32, #tpu.memory_space<vmem>>, vector<32x16xf32>
    %2 = arith.truncf %1 : vector<32x16xf32> to vector<32x16xbf16>
    %cst = arith.constant dense<0.000000e+00> : vector<32x128xf32>
    %3 = tpu.matmul %2, %0, %cst {dimension_numbers = #tpu.dot_dimension_numbers<[1], [0], [0], [1], [0, 0, 1, 1], [], []>} : vector<32x16xbf16>, vector<16x128xbf16>, vector<32x128xf32> -> vector<32x128xf32>
    %c0_3 = arith.constant 0 : index
    %c0_4 = arith.constant 0 : index
    %4 = vector.load %arg3[%c0_3, %c0_4] : memref<32x1xf32, #tpu.memory_space<vmem>>, vector<32x1xf32>
    %5 = vector.broadcast %4 : vector<32x1xf32> to vector<32x128xf32>
    %6 = arith.addf %3, %5 : vector<32x128xf32>
    %cst_5 = arith.constant 0.000000e+00 : f32
    %7 = vector.broadcast %cst_5 : f32 to vector<32x128xf32>
    %8 = arith.maximumf %6, %7 : vector<32x128xf32>
    %c0_6 = arith.constant 0 : index
    %c0_7 = arith.constant 0 : index
    %9 = vector.load %arg4[%c0_6, %c0_7] : memref<32x32xf32, #tpu.memory_space<vmem>>, vector<32x32xf32>
    %10 = arith.truncf %9 : vector<32x32xf32> to vector<32x32xbf16>
    %11 = arith.truncf %8 : vector<32x128xf32> to vector<32x128xbf16>
    %cst_8 = arith.constant dense<0.000000e+00> : vector<32x128xf32>
    %12 = tpu.matmul %10, %11, %cst_8 {dimension_numbers = #tpu.dot_dimension_numbers<[1], [0], [0], [1], [0, 0, 1, 1], [], []>} : vector<32x32xbf16>, vector<32x128xbf16>, vector<32x128xf32> -> vector<32x128xf32>
    %c0_9 = arith.constant 0 : index
    %c0_10 = arith.constant 0 : index
    %13 = vector.load %arg5[%c0_9, %c0_10] : memref<32x1xf32, #tpu.memory_space<vmem>>, vector<32x1xf32>
    %14 = vector.broadcast %13 : vector<32x1xf32> to vector<32x128xf32>
    %15 = arith.addf %12, %14 : vector<32x128xf32>
    %cst_11 = arith.constant 0.000000e+00 : f32
    %16 = vector.broadcast %cst_11 : f32 to vector<32x128xf32>
    %17 = arith.maximumf %15, %16 : vector<32x128xf32>
    %c0_12 = arith.constant 0 : index
    %c0_13 = arith.constant 0 : index
    %18 = vector.load %arg6[%c0_12, %c0_13] : memref<8x32xf32, #tpu.memory_space<vmem>>, vector<8x32xf32>
    %19 = arith.truncf %18 : vector<8x32xf32> to vector<8x32xbf16>
    %20 = arith.truncf %17 : vector<32x128xf32> to vector<32x128xbf16>
    %cst_14 = arith.constant dense<0.000000e+00> : vector<8x128xf32>
    %21 = tpu.matmul %19, %20, %cst_14 {dimension_numbers = #tpu.dot_dimension_numbers<[1], [0], [0], [1], [0, 0, 1, 1], [], []>} : vector<8x32xbf16>, vector<32x128xbf16>, vector<8x128xf32> -> vector<8x128xf32>
    %22 = vector.extract_strided_slice %21 {offsets = [0, 0], sizes = [1, 128], strides = [1, 1]} : vector<8x128xf32> to vector<1x128xf32>
    %c0_15 = arith.constant 0 : index
    %c0_16 = arith.constant 0 : index
    %23 = vector.load %arg7[%c0_15, %c0_16] : memref<1x1xf32, #tpu.memory_space<vmem>>, vector<1x1xf32>
    %24 = vector.broadcast %23 : vector<1x1xf32> to vector<1x128xf32>
    %25 = arith.addf %22, %24 : vector<1x128xf32>
    %c0_17 = arith.constant 0 : index
    %c0_18 = arith.constant 0 : index
    %26 = vector.load %arg8[%c0_17, %c0_18] : memref<1x128xf32, #tpu.memory_space<vmem>>, vector<1x128xf32>
    tpu.vector_store %arg8[%c0_17, %c0_18], %25 {strides = array<i32>} : memref<1x128xf32, #tpu.memory_space<vmem>>, vector<1x128xf32>,
    return
  }
  func.func @transform_0(%arg0: i32) -> (i32, i32) {
    %c0_i32 = arith.constant 0 : i32
    %c0_i32_0 = arith.constant 0 : i32
    return %c0_i32, %arg0 : i32, i32
  }
  func.func @transform_1(%arg0: i32) -> (i32, i32) {
    %c0_i32 = arith.constant 0 : i32
    %c0_i32_0 = arith.constant 0 : i32
    %c0_i32_1 = arith.constant 0 : i32
    return %c0_i32, %c0_i32_0 : i32, i32
  }
  func.func @transform_2(%arg0: i32) -> (i32, i32) {
    %c0_i32 = arith.constant 0 : i32
    %c0_i32_0 = arith.constant 0 : i32
    %c0_i32_1 = arith.constant 0 : i32
    return %c0_i32, %c0_i32_0 : i32, i32
  }
  func.func @transform_3(%arg0: i32) -> (i32, i32) {
    %c0_i32 = arith.constant 0 : i32
    %c0_i32_0 = arith.constant 0 : i32
    %c0_i32_1 = arith.constant 0 : i32
    return %c0_i32, %c0_i32_0 : i32, i32
  }
  func.func @transform_4(%arg0: i32) -> (i32, i32) {
    %c0_i32 = arith.constant 0 : i32
    %c0_i32_0 = arith.constant 0 : i32
    %c0_i32_1 = arith.constant 0 : i32
    return %c0_i32, %c0_i32_0 : i32, i32
  }
  func.func @transform_5(%arg0: i32) -> (i32, i32) {
    %c0_i32 = arith.constant 0 : i32
    %c0_i32_0 = arith.constant 0 : i32
    %c0_i32_1 = arith.constant 0 : i32
    return %c0_i32, %c0_i32_0 : i32, i32
  }
  func.func @transform_6(%arg0: i32) -> (i32, i32) {
    %c0_i32 = arith.constant 0 : i32
    %c0_i32_0 = arith.constant 0 : i32
    %c0_i32_1 = arith.constant 0 : i32
    return %c0_i32, %c0_i32_0 : i32, i32
  }
  func.func @transform_7(%arg0: i32) -> (i32, i32) {
    %c0_i32 = arith.constant 0 : i32
    %c0_i32_0 = arith.constant 0 : i32
    return %c0_i32, %arg0 : i32, i32
  }
}

</mosaic_0001>

<bundles_post_ra>
// kernel: _device_forward.3
= control target key start
LH: loop header
LB: loop body
LE: loop exit
PB: predicated region body
PF: predicated region fallthrough
CT: control target
= control target key end

     0   :  { %s1217_s18 = smov 0   ;;  %s1219_s19 = smov 0   ;;  %s1501_s0 = inlined_call_operand.vmem [shape: bf16[128,128], index: 0, kind: input, shape index: {}]   ;;  %s1502_s1 = inlined_call_operand.vmem [shape: f32[128,32], index: 1, kind: input, shape index: {}]   ;;  %s1503_s2 = inlined_call_operand.vmem [shape: f32[3,32,32], index: 2, kind: input, shape index: {}]   ;;  %s1504_s3 = inlined_call_operand.vmem [shape: f32[3,1,32], index: 3, kind: input, shape index: {}]   ;;  %s1505_s4 = inlined_call_operand.vmem [shape: f32[32,8], index: 4, kind: input, shape index: {}]   ;;  %s1506_s5 = inlined_call_operand.vmem [shape: f32[128,8], index: 5, kind: output, shape index: {}]  }
   0x1   :  { %s1221_s20 = smov 0  }
   0x2 LB: > { %s27_s21 = sadd.s32 1, %s1180_s19  ;;  %p982_p0 = scmp.ge.s32.totalorder %s1184_s20, 1  ;;  %s1184_s20 = sphi %s1221_s20, %s15_s20   ;;  %s1180_s19 = sphi %s1219_s19, %s1508_s19   ;;  %s1176_s18 = sphi %s1217_s18, %s1507_s18  }
   0x3   : > { %p29_p1 = scmp.ge.s32.totalorder %s27_s21, 3  ;;  %p211_p2 = scmp.lt.s32.totalorder %s1184_s20, 4 }
   0x5   : > { %s1510_s21 = smov (%p29_p1, %s27_s21), 0  ;;  %p212_p3 = pnand %p982_p0, %p211_p2 }
   0x6   : > { %p245_p4 = scmp.lt.s32.totalorder (!%p212_p3), %s1176_s18, 2  ;;  %p254_p5 = scmp.eq.s32.totalorder (!%p212_p3), %s1176_s18, 0 }
   0x7   : > { %215 = sbr.rel (%p212_p3) target bundleno = 712 (0x2c8), region = 40 }
   0xc   : > { %s1240_s22 = scalar_select %p245_p4, %s1176_s18, 2  ;;  %v260_v0 = vld [vmem:[%s1502_s1] sm:$0xff] (%p254_p5)  ;;  %vm276_vm0 = vcmask (%p254_p5), 261120   ;;  %v261_v1 = vld [vmem:[%s1502_s1 + $0x8] sm:$0xff] (%p254_p5)  ;;  %v262_v2 = vld [vmem:[%s1502_s1 + $0x10] sm:$0xff] (%p254_p5) }
   0xd   : > { %259 = sbr.rel (!%p254_p5) target bundleno = 21 (0x15), region = 44  ;;  %277 = vst.msk [vmem:[#allocation2] sm:$0xff] (%p254_p5), %vm276_vm0, %v260_v0  ;;  %278 = vst.msk [vmem:[#allocation2 + $0x8] sm:$0xff] (%p254_p5), %vm276_vm0, %v261_v1  ;;  %v263_v3 = vld [vmem:[%s1502_s1 + $0x18] sm:$0xff] (%p254_p5)  ;;  %v264_v4 = vld [vmem:[%s1502_s1 + $0x20] sm:$0xff] (%p254_p5) }
   0xe   : > { %s1014_s23 = sshll.u32 %s1240_s22, 5  ;;  %s252_s26 = scalar_lea.vmem %s1504_s3, %s1240_s22  ;;  %279 = vst.msk [vmem:[#allocation2 + $0x10] sm:$0xff] (%p254_p5), %vm276_vm0, %v262_v2  ;;  %v265_v5 = vld [vmem:[%s1502_s1 + $0x28] sm:$0xff] (%p254_p5)  ;;  %280 = vst.msk [vmem:[#allocation2 + $0x18] sm:$0xff] (%p254_p5), %vm276_vm0, %v263_v3  ;;  %v266_v6 = vld [vmem:[%s1502_s1 + $0x30] sm:$0xff] (%p254_p5) }
   0xf   : > { %s1250_s29 = scalar_lea.vmem %s1503_s2, %s1014_s23  ;;  %281 = vst.msk [vmem:[#allocation2 + $0x20] sm:$0xff] (%p254_p5), %vm276_vm0, %v264_v4  ;;  %282 = vst.msk [vmem:[#allocation2 + $0x28] sm:$0xff] (%p254_p5), %vm276_vm0, %v265_v5  ;;  %v267_v7 = vld [vmem:[%s1502_s1 + $0x38] sm:$0xff] (%p254_p5)  ;;  %v268_v8 = vld [vmem:[%s1502_s1 + $0x40] sm:$0xff] (%p254_p5) }
  0x10   : > { %283 = vst.msk [vmem:[#allocation2 + $0x30] sm:$0xff] (%p254_p5), %vm276_vm0, %v266_v6  ;;  %284 = vst.msk [vmem:[#allocation2 + $0x38] sm:$0xff] (%p254_p5), %vm276_vm0, %v267_v7  ;;  %v269_v9 = vld [vmem:[%s1502_s1 + $0x48] sm:$0xff] (%p254_p5)  ;;  %v270_v10 = vld [vmem:[%s1502_s1 + $0x50] sm:$0xff] (%p254_p5) }
  0x11   : > { %285 = vst.msk [vmem:[#allocation2 + $0x40] sm:$0xff] (%p254_p5), %vm276_vm0, %v268_v8  ;;  %v271_v11 = vld [vmem:[%s1502_s1 + $0x58] sm:$0xff] (%p254_p5)  ;;  %286 = vst.msk [vmem:[#allocation2 + $0x48] sm:$0xff] (%p254_p5), %vm276_vm0, %v269_v9  ;;  %v272_v12 = vld [vmem:[%s1502_s1 + $0x60] sm:$0xff] (%p254_p5) }
  0x12   : > { %287 = vst.msk [vmem:[#allocation2 + $0x50] sm:$0xff] %vm276_vm0, %v270_v10  ;;  %288 = vst.msk [vmem:[#allocation2 + $0x58] sm:$0xff] %vm276_vm0, %v271_v11  ;;  %v273_v13 = vld [vmem:[%s1502_s1 + $0x68] sm:$0xff]  ;;  %v274_v14 = vld [vmem:[%s1502_s1 + $0x70] sm:$0xff] }
  0x13   : > { %289 = vst.msk [vmem:[#allocation2 + $0x60] sm:$0xff] %vm276_vm0, %v272_v12  ;;  %290 = vst.msk [vmem:[#allocation2 + $0x68] sm:$0xff] %vm276_vm0, %v273_v13  ;;  %v275_v15 = vld [vmem:[%s1502_s1 + $0x78] sm:$0xff] }
  0x14   : > { %291 = vst.msk [vmem:[#allocation2 + $0x70] sm:$0xff] %vm276_vm0, %v274_v14  ;;  %292 = vst.msk [vmem:[#allocation2 + $0x78] sm:$0xff] %vm276_vm0, %v275_v15 }
  0x15 PF: > { %vm296_vm1 = vcmask 261120   ;;  %v1186_v21 = vmov 0.0   ;;  %v1154_v28 = vld [vmem:[%s1501_s0] sm:$0xff]   ;;  %v1155_v42 = vld [vmem:[%s1501_s0 + $0x8] sm:$0xff]   ;;  %v1156_v43 = vld [vmem:[%s1501_s0 + $0x10] sm:$0xff]   ;;  %p742_p6 = scmp.eq.s32.totalorder %s1176_s18, 2 }
  0x16   : > { %299 = vst.msk [vmem:[#allocation3 + $0x10] sm:$0xff] %vm296_vm1, %v1186_v21  ;;  %297 = vst.msk [vmem:[#allocation3] sm:$0xff] %vm296_vm1, %v1186_v21  ;;  %1069 = vmatprep.mubr.bf16.mxu0 %v1154_v28  ;;  %v1157_v44 = vld [vmem:[%s1501_s0 + $0x18] sm:$0xff]   ;;  %v1158_v45 = vld [vmem:[%s1501_s0 + $0x20] sm:$0xff]   ;;  %vm898_vm2 = vcmask (%p742_p6), 64512  }
  0x17   : > { %298 = vst.msk [vmem:[#allocation3 + $0x8] sm:$0xff] %vm296_vm1, %v1186_v21  ;;  %300 = vst.msk [vmem:[#allocation3 + $0x18] sm:$0xff] %vm296_vm1, %v1186_v21  ;;  %v315_v39 = vld [vmem:[#allocation2] sm:$0xff]  ;;  %v316_v40 = vld [vmem:[#allocation2 + $0x8] sm:$0xff] }
  0x18   : > { %301 = vst.msk [vmem:[#allocation3 + $0x20] sm:$0xff] %vm296_vm1, %v1186_v21  ;;  %302 = vst.msk [vmem:[#allocation3 + $0x28] sm:$0xff] %vm296_vm1, %v1186_v21  ;;  %v317_v36 = vld [vmem:[#allocation2 + $0x10] sm:$0xff]  ;;  %v318_v37 = vld [vmem:[#allocation2 + $0x18] sm:$0xff]  ;;  %v363_v41 = vpack.c.bf16 %v316_v40, %v315_v39 }
  0x19   : > { %303 = vst.msk [vmem:[#allocation3 + $0x30] sm:$0xff] %vm296_vm1, %v1186_v21  ;;  %304 = vst.msk [vmem:[#allocation3 + $0x38] sm:$0xff] %vm296_vm1, %v1186_v21  ;;  %v319_v33 = vld [vmem:[#allocation2 + $0x20] sm:$0xff]  ;;  %v320_v34 = vld [vmem:[#allocation2 + $0x28] sm:$0xff]  ;;  %v364_v38 = vpack.c.bf16 %v318_v37, %v317_v36 }
  0x1a   : > { %v327_v18 = vld [vmem:[#allocation2 + $0x60] sm:$0xff]  ;;  %v328_v20 = vld [vmem:[#allocation2 + $0x68] sm:$0xff]  ;;  %305 = vst.msk [vmem:[#allocation3 + $0x40] sm:$0xff] %vm296_vm1, %v1186_v21  ;;  %306 = vst.msk [vmem:[#allocation3 + $0x48] sm:$0xff] %vm296_vm1, %v1186_v21  ;;  %v365_v35 = vpack.c.bf16 %v320_v34, %v319_v33 }
  0x1b   : > { %v329_v16 = vld [vmem:[#allocation2 + $0x70] sm:$0xff]  ;;  %v330_v17 = vld [vmem:[#allocation2 + $0x78] sm:$0xff]  ;;  %307 = vst.msk [vmem:[#allocation3 + $0x50] sm:$0xff] %vm296_vm1, %v1186_v21  ;;  %308 = vst.msk [vmem:[#allocation3 + $0x58] sm:$0xff] %vm296_vm1, %v1186_v21  ;;  %v369_v22 = vpack.c.bf16 %v328_v20, %v327_v18 }
  0x1c   : > { %v370_v19 = vpack.c.bf16 %v330_v17, %v329_v16  ;;  %309 = vst.msk [vmem:[#allocation3 + $0x60] sm:$0xff] %vm296_vm1, %v1186_v21  ;;  %310 = vst.msk [vmem:[#allocation3 + $0x68] sm:$0xff] %vm296_vm1, %v1186_v21  ;;  %v325_v23 = vld [vmem:[#allocation2 + $0x50] sm:$0xff]  ;;  %v326_v24 = vld [vmem:[#allocation2 + $0x58] sm:$0xff] }
  0x1d   : > { %311 = vst.msk [vmem:[#allocation3 + $0x70] sm:$0xff] %vm296_vm1, %v1186_v21  ;;  %312 = vst.msk [vmem:[#allocation3 + $0x78] sm:$0xff] %vm296_vm1, %v1186_v21  ;;  %v323_v25 = vld [vmem:[#allocation2 + $0x40] sm:$0xff]  ;;  %v368_v26 = vpack.c.bf16 %v326_v24, %v325_v23  ;;  %v324_v27 = vld [vmem:[#allocation2 + $0x48] sm:$0xff] }
  0x1e   : > { %1053 = vmatprep.subr.bf16.mxu0 %v370_v19  ;;  %v367_v29 = vpack.c.bf16 %v324_v27, %v323_v25  ;;  %v321_v30 = vld [vmem:[#allocation2 + $0x30] sm:$0xff]  ;;  %v322_v31 = vld [vmem:[#allocation2 + $0x38] sm:$0xff]  ;;  %v1159_v46 = vld [vmem:[%s1501_s0 + $0x28] sm:$0xff]  }
  0x1f   : > { %1054 = vmatpush3.bf16.msra.mxu0 %v370_v19  ;;  %v366_v32 = vpack.c.bf16 %v322_v31, %v321_v30  ;;  %v1160_v47 = vld [vmem:[%s1501_s0 + $0x30] sm:$0xff]   ;;  %v1161_v48 = vld [vmem:[%s1501_s0 + $0x38] sm:$0xff]   ;;  %v576_v52 = vld [vmem:[%s1250_s29] sm:$0xff] }
  0x20   : > { %1055 = vmatprep.subr.bf16.mxu0 %v369_v22  ;;  %v578_v49 = vld [vmem:[%s1250_s29 + $0x10] sm:$0xff]  ;;  %v579_v50 = vld [vmem:[%s1250_s29 + $0x18] sm:$0xff]  ;;  %v577_v53 = vld [vmem:[%s1250_s29 + $0x8] sm:$0xff] }
  0x21   : > { %v581_v51 = vpack.c.bf16 %v579_v50, %v578_v49  ;;  %v580_v54 = vpack.c.bf16 %v577_v53, %v576_v52  ;;  %v333_v55 = vld [vmem:[#allocation3 + $0x10] sm:$0xff]  ;;  %v331_v57 = vld [vmem:[#allocation3] sm:$0xff]  ;;  %v334_v60 = vld [vmem:[#allocation3 + $0x18] sm:$0xff] }
  0x22   : > { %v332_v63 = vld [vmem:[#allocation3 + $0x8] sm:$0xff]  ;;  %v337_v2 = vld [vmem:[#allocation3 + $0x30] sm:$0xff]  ;;  %v335_v5 = vld [vmem:[#allocation3 + $0x20] sm:$0xff] }
  0x23   : > { %1056 = vmatpush3.bf16.msra.mxu0 %v369_v22  ;;  %1085 = vmatprep.subr.bf16.mxu1 %v581_v51  ;;  %v338_v8 = vld [vmem:[#allocation3 + $0x38] sm:$0xff]  ;;  %v336_v11 = vld [vmem:[#allocation3 + $0x28] sm:$0xff]  ;;  %v341_v14 = vld [vmem:[#allocation3 + $0x50] sm:$0xff] }
  0x24   : > { %1057 = vmatprep.subr.bf16.mxu0 %v368_v26  ;;  %1086 = vmatpush3.bf16.msra.mxu1 %v581_v51  ;;  %v339_v18 = vld [vmem:[#allocation3 + $0x40] sm:$0xff]  ;;  %v342_v25 = vld [vmem:[#allocation3 + $0x58] sm:$0xff] }
  0x25   : > { %1087 = vmatprep.subr.bf16.mxu1 %v580_v54  ;;  %v343_v36 = vld [vmem:[#allocation3 + $0x60] sm:$0xff] }
  0x27   : > { %1058 = vmatpush3.bf16.msra.mxu0 %v368_v26 }
  0x28   : > { %1059 = vmatprep.subr.bf16.mxu0 %v367_v29  ;;  %1088 = vmatpush3.bf16.msra.mxu1 %v580_v54 }
  0x2b   : > { %1060 = vmatpush3.bf16.msra.mxu0 %v367_v29  ;;  %v340_v29 = vld [vmem:[#allocation3 + $0x48] sm:$0xff] }
  0x2c   : > { %1061 = vmatprep.subr.bf16.mxu0 %v366_v32 }
  0x2f   : > { %1062 = vmatpush3.bf16.msra.mxu0 %v366_v32  ;;  %v345_v32 = vld [vmem:[#allocation3 + $0x70] sm:$0xff] }
  0x30   : > { %1063 = vmatprep.subr.bf16.mxu0 %v365_v35 }
  0x33   : > { %1064 = vmatpush3.bf16.msra.mxu0 %v365_v35 }
  0x34   : > { %1065 = vmatprep.subr.bf16.mxu0 %v364_v38 }
  0x37   : > { %1066 = vmatpush3.bf16.msra.mxu0 %v364_v38 }
  0x38   : > { %1067 = vmatprep.subr.bf16.mxu0 %v363_v41 }
  0x3b   : > { %1068 = vmatpush3.bf16.msra.mxu0 %v363_v41 }
  0x3e   : > { %1070 = vmatmul.mubr.bf16.vlgmr.msra.gmra.mxu0 %v1155_v42 }
  0x3f   : > { %1073 = vmatprep.mubr.bf16.mxu0 %v1156_v43  ;;  %v346_v43 = vld [vmem:[#allocation3 + $0x78] sm:$0xff] }
  0x46   : > { %1074 = vmatmul.mubr.bf16.gmra.mxu0 %v1157_v44 }
  0x47   : > { %1077 = vmatprep.mubr.bf16.mxu0 %v1158_v45 }
  0x4e   : > { %1078 = vmatmul.mubr.bf16.gmra.mxu0 %v1159_v46 }
  0x4f   : > { %1081 = vmatprep.mubr.bf16.mxu0 %v1160_v47  ;;  %v344_v47 = vld [vmem:[#allocation3 + $0x68] sm:$0xff] }
  0x56   : > { %1082 = vmatmul.mubr.bf16.gmra.mxu0 %v1161_v48 }
  0xfe   : > { %v1071_v56 = vpop.f32.mrf.mxu0 }
  0xff   : > { %v518_v58 = vadd.f32 %v1071_v56, %v333_v55 }
 0x100   : > { %v453_v59 = vpop.f32.mrf.mxu0 }
 0x101   : > { %535 = vst.msk [vmem:[#allocation3 + $0x10] sm:$0xff] %vm296_vm1, %v518_v58  ;;  %v516_v61 = vadd.f32 %v453_v59, %v331_v57 }
 0x102   : > { %v1072_v62 = vpop.f32.mrf.mxu0 }
 0x103   : > { %533 = vst.msk [vmem:[#allocation3] sm:$0xff] %vm296_vm1, %v516_v61  ;;  %v519_v0 = vadd.f32 %v1072_v62, %v334_v60 }
 0x104   : > { %v456_v1 = vpop.f32.mrf.mxu0 }
 0x105   : > { %536 = vst.msk [vmem:[#allocation3 + $0x18] sm:$0xff] %vm296_vm1, %v519_v0  ;;  %v517_v3 = vadd.f32 %v456_v1, %v332_v63  ;;  %v994_v63 = vld [vmem:[%s252_s26] ss:$0 sm:$0xff] }
 0x106   : > { %v1075_v4 = vpop.f32.mrf.mxu0 }
 0x107   : > { %534 = vst.msk [vmem:[#allocation3 + $0x8] sm:$0xff] %vm296_vm1, %v517_v3  ;;  %v522_v6 = vadd.f32 %v1075_v4, %v337_v2 }
 0x108   : > { %v469_v7 = vpop.f32.mrf.mxu0  ;;  %v554_v23 = vld [vmem:[#allocation3 + $0x10] sm:$0xff] }
 0x109   : > { %539 = vst.msk [vmem:[#allocation3 + $0x30] sm:$0xff] %vm296_vm1, %v522_v6  ;;  %v520_v9 = vadd.f32 %v469_v7, %v335_v5 }
 0x10a   : > { %v1076_v10 = vpop.f32.mrf.mxu0  ;;  %v552_v19 = vld [vmem:[#allocation3] sm:$0xff] }
 0x10b   : > { %537 = vst.msk [vmem:[#allocation3 + $0x20] sm:$0xff] %vm296_vm1, %v520_v9  ;;  %v523_v12 = vadd.f32 %v1076_v10, %v338_v8 }
 0x10c   : > { %v472_v13 = vpop.f32.mrf.mxu0  ;;  %v555_v16 = vld [vmem:[#allocation3 + $0x18] sm:$0xff] }
 0x10d   : > { %540 = vst.msk [vmem:[#allocation3 + $0x38] sm:$0xff] %vm296_vm1, %v523_v12  ;;  %v521_v15 = vadd.f32 %v472_v13, %v336_v11  ;;  %v569_v26 = vpack.c.bf16 %v555_v16, %v554_v23 }
 0x10e   : > { %v1079_v17 = vpop.f32.mrf.mxu0  ;;  %v553_v20 = vld [vmem:[#allocation3 + $0x8] sm:$0xff] }
 0x10f   : > { %538 = vst.msk [vmem:[#allocation3 + $0x28] sm:$0xff] %vm296_vm1, %v521_v15  ;;  %v526_v21 = vadd.f32 %v1079_v17, %v341_v14  ;;  %v568_v22 = vpack.c.bf16 %v553_v20, %v552_v19 }
 0x110   : > { %v485_v24 = vpop.f32.mrf.mxu0  ;;  %v558_v41 = vld [vmem:[#allocation3 + $0x30] sm:$0xff] }
 0x111   : > { %543 = vst.msk [vmem:[#allocation3 + $0x50] sm:$0xff] %vm296_vm1, %v526_v21  ;;  %v524_v27 = vadd.f32 %v485_v24, %v339_v18  ;;  %1089 = vmatprep.mubr.msk.bf16.mxu1 %vm296_vm1, %v568_v22 }
 0x112   : > { %v1080_v28 = vpop.f32.mrf.mxu0  ;;  %1090 = vmatmul.mubr.msk.bf16.vlgmr.msra.gmra.mxu1 %vm296_vm1, %v569_v26  ;;  %v556_v37 = vld [vmem:[#allocation3 + $0x20] sm:$0xff] }
 0x113   : > { %541 = vst.msk [vmem:[#allocation3 + $0x40] sm:$0xff] %vm296_vm1, %v524_v27  ;;  %v527_v30 = vadd.f32 %v1080_v28, %v342_v25 }
 0x114   : > { %v488_v31 = vpop.f32.mrf.mxu0  ;;  %v559_v34 = vld [vmem:[#allocation3 + $0x38] sm:$0xff] }
 0x115   : > { %544 = vst.msk [vmem:[#allocation3 + $0x58] sm:$0xff] %vm296_vm1, %v527_v30  ;;  %v525_v33 = vadd.f32 %v488_v31, %v340_v29  ;;  %v571_v44 = vpack.c.bf16 %v559_v34, %v558_v41 }
 0x116   : > { %v1083_v35 = vpop.f32.mrf.mxu0  ;;  %v557_v38 = vld [vmem:[#allocation3 + $0x28] sm:$0xff] }
 0x117   : > { %542 = vst.msk [vmem:[#allocation3 + $0x48] sm:$0xff] %vm296_vm1, %v525_v33  ;;  %v530_v39 = vadd.f32 %v1083_v35, %v345_v32  ;;  %v570_v40 = vpack.c.bf16 %v557_v38, %v556_v37 }
 0x118   : > { %v501_v42 = vpop.f32.mrf.mxu0  ;;  %v562_v55 = vld [vmem:[#allocation3 + $0x50] sm:$0xff] }
 0x119   : > { %547 = vst.msk [vmem:[#allocation3 + $0x70] sm:$0xff] %vm296_vm1, %v530_v39  ;;  %v528_v45 = vadd.f32 %v501_v42, %v343_v36  ;;  %1093 = vmatprep.mubr.msk.bf16.mxu1 %vm296_vm1, %v570_v40 }
 0x11a   : > { %v1084_v46 = vpop.f32.mrf.mxu0  ;;  %1094 = vmatmul.mubr.msk.bf16.gmra.mxu1 %vm296_vm1, %v571_v44  ;;  %v560_v52 = vld [vmem:[#allocation3 + $0x40] sm:$0xff] }
 0x11b   : > { %545 = vst.msk [vmem:[#allocation3 + $0x60] sm:$0xff] %vm296_vm1, %v528_v45  ;;  %v531_v48 = vadd.f32 %v1084_v46, %v346_v43 }
 0x11c   : > { %v504_v49 = vpop.f32.mrf.mxu0  ;;  %v563_v51 = vld [vmem:[#allocation3 + $0x58] sm:$0xff] }
 0x11d   : > { %548 = vst.msk [vmem:[#allocation3 + $0x78] sm:$0xff] %vm296_vm1, %v531_v48  ;;  %v529_v50 = vadd.f32 %v504_v49, %v344_v47  ;;  %v573_v56 = vpack.c.bf16 %v563_v51, %v562_v55  ;;  %v773_v48 = vld [vmem:[%s1505_s4 + $0x10] sm:$0xff] (%p742_p6)  ;;  %v774_v49 = vld [vmem:[%s1505_s4 + $0x18] sm:$0xff] (%p742_p6) }
 0x11e   : > { %v561_v53 = vld [vmem:[#allocation3 + $0x48] sm:$0xff]  ;;  %v776_v51 = vpack.c.bf16 (%p742_p6), %v774_v49, %v773_v48 }
 0x11f   : > { %546 = vst.msk [vmem:[#allocation3 + $0x68] sm:$0xff] %vm296_vm1, %v529_v50  ;;  %v572_v54 = vpack.c.bf16 %v561_v53, %v560_v52  ;;  %v771_v50 = vld [vmem:[%s1505_s4] sm:$0xff] (%p742_p6)  ;;  %v772_v52 = vld [vmem:[%s1505_s4 + $0x8] sm:$0xff] (%p742_p6) }
 0x120   : > { %v566_v61 = vld [vmem:[#allocation3 + $0x70] sm:$0xff]  ;;  %v775_v55 = vpack.c.bf16 (%p742_p6), %v772_v52, %v771_v50  ;;  %1105 = vmatprep.subr.bf16.mxu0 (%p742_p6), %v776_v51  ;;  %1125 = vmatprep.subr.bf16.mxu1 (%p742_p6), %v776_v51 }
 0x121   : > { %1097 = vmatprep.mubr.msk.bf16.mxu1 %vm296_vm1, %v572_v54  ;;  %1106 = vmatpush3.bf16.msra.mxu0 (%p742_p6), %v776_v51 }
 0x122   : > { %1098 = vmatmul.mubr.msk.bf16.gmra.mxu1 %vm296_vm1, %v573_v56  ;;  %v564_v58 = vld [vmem:[#allocation3 + $0x60] sm:$0xff]  ;;  %1107 = vmatprep.subr.bf16.mxu0 (%p742_p6), %v775_v55 }
 0x123   : > { %1127 = vmatpush3.bf16.msra.mxu1 (%p742_p6), %v776_v51 }
 0x124   : > { %v567_v57 = vld [vmem:[#allocation3 + $0x78] sm:$0xff]  ;;  %1126 = vmatprep.subr.bf16.mxu1 (%p742_p6), %v775_v55 }
 0x125   : > { %v575_v62 = vpack.c.bf16 %v567_v57, %v566_v61  ;;  %1108 = vmatpush3.bf16.msra.mxu0 (%p742_p6), %v775_v55 }
 0x126   : > { %v565_v59 = vld [vmem:[#allocation3 + $0x68] sm:$0xff] }
 0x127   : > { %v574_v60 = vpack.c.bf16 %v565_v59, %v564_v58  ;;  %1128 = vmatpush3.bf16.msra.mxu1 (%p742_p6), %v775_v55 }
 0x129   : > { %1101 = vmatprep.mubr.msk.bf16.mxu1 %vm296_vm1, %v574_v60 }
 0x12a   : > { %1102 = vmatmul.mubr.msk.bf16.gmra.mxu1 %vm296_vm1, %v575_v62 }
 0x1d2   : > { %v1091_v0 = vpop.f32.mrf.mxu1 }
 0x1d3   : > { %v656_v1 = vadd.f32 %v1091_v0, %v994_v63 }
 0x1d4   : > { %v647_v2 = vpop.f32.mrf.mxu1 }
 0x1d5   : > { %v712_v3 = vmax.f32 %v656_v1, 0.0  ;;  %v648_v4 = vadd.f32 %v994_v63, %v647_v2 }
 0x1d6   : > { %v1092_v5 = vpop.f32.mrf.mxu1 }
 0x1d7   : > { %728 = vst.msk [vmem:[#allocation2 + $0x10] sm:$0xff] %vm296_vm1, %v712_v3  ;;  %v710_v6 = vmax.f32 %v648_v4, 0.0  ;;  %v659_v7 = vadd.f32 %v1092_v5, %v994_v63 }
 0x1d8   : > { %v650_v8 = vpop.f32.mrf.mxu1 }
 0x1d9   : > { %726 = vst.msk [vmem:[#allocation2] sm:$0xff] %vm296_vm1, %v710_v6  ;;  %v713_v9 = vmax.f32 %v659_v7, 0.0  ;;  %v651_v10 = vadd.f32 %v994_v63, %v650_v8 }
 0x1da   : > { %v1095_v11 = vpop.f32.mrf.mxu1 }
 0x1db   : > { %729 = vst.msk [vmem:[#allocation2 + $0x18] sm:$0xff] %vm296_vm1, %v713_v9  ;;  %v711_v12 = vmax.f32 %v651_v10, 0.0  ;;  %v672_v13 = vadd.f32 %v1095_v11, %v994_v63 }
 0x1dc   : > { %v663_v14 = vpop.f32.mrf.mxu1 }
 0x1dd   : > { %727 = vst.msk [vmem:[#allocation2 + $0x8] sm:$0xff] %vm296_vm1, %v711_v12  ;;  %v716_v15 = vmax.f32 %v672_v13, 0.0  ;;  %v664_v16 = vadd.f32 %v994_v63, %v663_v14 }
 0x1de   : > { %v1096_v17 = vpop.f32.mrf.mxu1  ;;  %v749_v60 = vld [vmem:[#allocation2 + $0x10] sm:$0xff] (%p742_p6) }
 0x1df   : > { %732 = vst.msk [vmem:[#allocation2 + $0x30] sm:$0xff] %vm296_vm1, %v716_v15  ;;  %v714_v18 = vmax.f32 %v664_v16, 0.0  ;;  %v675_v19 = vadd.f32 %v1096_v17, %v994_v63 }
 0x1e0   : > { %v666_v20 = vpop.f32.mrf.mxu1  ;;  %v747_v53 = vld [vmem:[#allocation2] sm:$0xff] (%p742_p6) }
 0x1e1   : > { %730 = vst.msk [vmem:[#allocation2 + $0x20] sm:$0xff] %vm296_vm1, %v714_v18  ;;  %v717_v21 = vmax.f32 %v675_v19, 0.0  ;;  %v667_v22 = vadd.f32 %v994_v63, %v666_v20 }
 0x1e2   : > { %v1099_v23 = vpop.f32.mrf.mxu1  ;;  %v750_v61 = vld [vmem:[#allocation2 + $0x18] sm:$0xff] (%p742_p6) }
 0x1e3   : > { %733 = vst.msk [vmem:[#allocation2 + $0x38] sm:$0xff] %vm296_vm1, %v717_v21  ;;  %v715_v24 = vmax.f32 %v667_v22, 0.0  ;;  %v688_v25 = vadd.f32 %v1099_v23, %v994_v63  ;;  %v764_v4 = vpack.c.bf16 (%p742_p6), %v750_v61, %v749_v60 }
 0x1e4   : > { %v679_v26 = vpop.f32.mrf.mxu1  ;;  %v748_v54 = vld [vmem:[#allocation2 + $0x8] sm:$0xff] (%p742_p6) }
 0x1e5   : > { %731 = vst.msk [vmem:[#allocation2 + $0x28] sm:$0xff] %vm296_vm1, %v715_v24  ;;  %v720_v27 = vmax.f32 %v688_v25, 0.0  ;;  %v680_v28 = vadd.f32 %v994_v63, %v679_v26  ;;  %v763_v56 = vpack.c.bf16 (%p742_p6), %v748_v54, %v747_v53 }
 0x1e6   : > { %v1100_v29 = vpop.f32.mrf.mxu1  ;;  %v753_v8 = vld [vmem:[#allocation2 + $0x30] sm:$0xff] (%p742_p6) }
 0x1e7   : > { %736 = vst.msk [vmem:[#allocation2 + $0x50] sm:$0xff] %vm296_vm1, %v720_v27  ;;  %v718_v30 = vmax.f32 %v680_v28, 0.0  ;;  %v691_v31 = vadd.f32 %v1100_v29, %v994_v63  ;;  %1109 = vmatprep.mubr.msk.bf16.mxu0 (%p742_p6), %vm296_vm1, %v763_v56 }
 0x1e8   : > { %v682_v32 = vpop.f32.mrf.mxu1  ;;  %v751_v0 = vld [vmem:[#allocation2 + $0x20] sm:$0xff] (%p742_p6)  ;;  %1110 = vmatmul.mubr.msk.bf16.vlgmr.msra.gmra.mxu0 (%p742_p6), %vm296_vm1, %v764_v4 }
 0x1e9   : > { %734 = vst.msk [vmem:[#allocation2 + $0x40] sm:$0xff] %vm296_vm1, %v718_v30  ;;  %v721_v33 = vmax.f32 %v691_v31, 0.0  ;;  %v683_v34 = vadd.f32 %v994_v63, %v682_v32 }
 0x1ea   : > { %v1103_v35 = vpop.f32.mrf.mxu1  ;;  %v754_v9 = vld [vmem:[#allocation2 + $0x38] sm:$0xff] (%p742_p6) }
 0x1eb   : > { %737 = vst.msk [vmem:[#allocation2 + $0x58] sm:$0xff] %vm296_vm1, %v721_v33  ;;  %v719_v36 = vmax.f32 %v683_v34, 0.0  ;;  %v704_v37 = vadd.f32 %v1103_v35, %v994_v63  ;;  %v766_v12 = vpack.c.bf16 (%p742_p6), %v754_v9, %v753_v8 }
 0x1ec   : > { %v695_v38 = vpop.f32.mrf.mxu1  ;;  %v752_v1 = vld [vmem:[#allocation2 + $0x28] sm:$0xff] (%p742_p6) }
 0x1ed   : > { %735 = vst.msk [vmem:[#allocation2 + $0x48] sm:$0xff] %vm296_vm1, %v719_v36  ;;  %v724_v39 = vmax.f32 %v704_v37, 0.0  ;;  %v696_v40 = vadd.f32 %v994_v63, %v695_v38  ;;  %v765_v6 = vpack.c.bf16 (%p742_p6), %v752_v1, %v751_v0 }
 0x1ee   : > { %v1104_v41 = vpop.f32.mrf.mxu1  ;;  %v757_v62 = vld [vmem:[#allocation2 + $0x50] sm:$0xff] (%p742_p6) }
 0x1ef   : > { %740 = vst.msk [vmem:[#allocation2 + $0x70] sm:$0xff] %vm296_vm1, %v724_v39  ;;  %v722_v42 = vmax.f32 %v696_v40, 0.0  ;;  %v707_v43 = vadd.f32 %v1104_v41, %v994_v63  ;;  %1113 = vmatprep.mubr.msk.bf16.mxu0 (%p742_p6), %vm296_vm1, %v765_v6 }
 0x1f0   : > { %v698_v44 = vpop.f32.mrf.mxu1  ;;  %v755_v57 = vld [vmem:[#allocation2 + $0x40] sm:$0xff] (%p742_p6)  ;;  %1114 = vmatmul.mubr.msk.bf16.gmra.mxu0 (%p742_p6), %vm296_vm1, %v766_v12 }
 0x1f1   : > { %738 = vst.msk [vmem:[#allocation2 + $0x60] sm:$0xff] %vm296_vm1, %v722_v42  ;;  %v725_v45 = vmax.f32 %v707_v43, 0.0  ;;  %v699_v46 = vadd.f32 %v994_v63, %v698_v44  ;;  %746 = sbr.rel (!%p742_p6) target bundleno = 712 (0x2c8), region = 56 }
 0x1f2   : > { %v758_v63 = vld [vmem:[#allocation2 + $0x58] sm:$0xff] (%p742_p6) }
 0x1f3   : > { %741 = vst.msk [vmem:[#allocation2 + $0x78] sm:$0xff] %vm296_vm1, %v725_v45  ;;  %v723_v47 = vmax.f32 %v699_v46, 0.0  ;;  %v768_v5 = vpack.c.bf16 (%p742_p6), %v758_v63, %v757_v62 }
 0x1f4   : > { %v756_v58 = vld [vmem:[#allocation2 + $0x48] sm:$0xff] (%p742_p6) }
 0x1f5   : > { %739 = vst.msk [vmem:[#allocation2 + $0x68] sm:$0xff] %vm296_vm1, %v723_v47  ;;  %v767_v59 = vpack.c.bf16 (%p742_p6), %v756_v58, %v755_v57 }
 0x1f6   : > { %v761_v10 = vld [vmem:[#allocation2 + $0x70] sm:$0xff] }
 0x1f7   : > { %1117 = vmatprep.mubr.msk.bf16.mxu1 %vm296_vm1, %v767_v59 }
 0x1f8   : > { %v759_v2 = vld [vmem:[#allocation2 + $0x60] sm:$0xff]  ;;  %1118 = vmatmul.mubr.msk.bf16.vlgmr.msra.gmra.mxu1 %vm296_vm1, %v768_v5 }
 0x1fa   : > { %v762_v11 = vld [vmem:[#allocation2 + $0x78] sm:$0xff] }
 0x1fb   : > { %v770_v13 = vpack.c.bf16 %v762_v11, %v761_v10 }
 0x1fc   : > { %v760_v3 = vld [vmem:[#allocation2 + $0x68] sm:$0xff] }
 0x1fd   : > { %v769_v7 = vpack.c.bf16 %v760_v3, %v759_v2 }
 0x1ff   : > { %1121 = vmatprep.mubr.msk.bf16.mxu1 %vm296_vm1, %v769_v7 }
 0x200   : > { %1122 = vmatmul.mubr.msk.bf16.gmra.mxu1 %vm296_vm1, %v770_v13 }
 0x2a8   : > { %v1111_v14 = vpop.f32.mrf.mxu0 }
 0x2a9   : > { %901 = vst.msk [vmem:[%s1506_s5 + $0x10] sm:$0xff] %vm898_vm2, %v1111_v14 }
 0x2aa   : > { %v835_v16 = vpop.f32.mrf.mxu0 }
 0x2ab   : > { %899 = vst.msk [vmem:[%s1506_s5] sm:$0xff] %vm898_vm2, %v835_v16 }
 0x2ac   : > { %v1112_v18 = vpop.f32.mrf.mxu0 }
 0x2ad   : > { %902 = vst.msk [vmem:[%s1506_s5 + $0x18] sm:$0xff] %vm898_vm2, %v1112_v18 }
 0x2ae   : > { %v838_v20 = vpop.f32.mrf.mxu0 }
 0x2af   : > { %900 = vst.msk [vmem:[%s1506_s5 + $0x8] sm:$0xff] %vm898_vm2, %v838_v20 }
 0x2b0   : > { %v1115_v22 = vpop.f32.mrf.mxu0 }
 0x2b1   : > { %905 = vst.msk [vmem:[%s1506_s5 + $0x30] sm:$0xff] %vm898_vm2, %v1115_v22 }
 0x2b2   : > { %v851_v24 = vpop.f32.mrf.mxu0 }
 0x2b3   : > { %903 = vst.msk [vmem:[%s1506_s5 + $0x20] sm:$0xff] %vm898_vm2, %v851_v24 }
 0x2b4   : > { %v1116_v26 = vpop.f32.mrf.mxu0 }
 0x2b5   : > { %906 = vst.msk [vmem:[%s1506_s5 + $0x38] sm:$0xff] %vm898_vm2, %v1116_v26 }
 0x2b6   : > { %v854_v28 = vpop.f32.mrf.mxu0 }
 0x2b7   : > { %904 = vst.msk [vmem:[%s1506_s5 + $0x28] sm:$0xff] %vm898_vm2, %v854_v28 }
 0x2b8   : > { %v1119_v15 = vpop.f32.mrf.mxu1 }
 0x2b9   : > { %909 = vst.msk [vmem:[%s1506_s5 + $0x50] sm:$0xff] %vm898_vm2, %v1119_v15 }
 0x2ba   : > { %v867_v17 = vpop.f32.mrf.mxu1 }
 0x2bb   : > { %907 = vst.msk [vmem:[%s1506_s5 + $0x40] sm:$0xff] %vm898_vm2, %v867_v17 }
 0x2bc   : > { %v1120_v19 = vpop.f32.mrf.mxu1 }
 0x2bd   : > { %910 = vst.msk [vmem:[%s1506_s5 + $0x58] sm:$0xff] %vm898_vm2, %v1120_v19 }
 0x2be   : > { %v870_v21 = vpop.f32.mrf.mxu1 }
 0x2bf   : > { %908 = vst.msk [vmem:[%s1506_s5 + $0x48] sm:$0xff] %vm898_vm2, %v870_v21 }
 0x2c0   : > { %v1123_v23 = vpop.f32.mrf.mxu1 }
 0x2c1   : > { %913 = vst.msk [vmem:[%s1506_s5 + $0x70] sm:$0xff] %vm898_vm2, %v1123_v23 }
 0x2c2   : > { %v883_v25 = vpop.f32.mrf.mxu1 }
 0x2c3   : > { %911 = vst.msk [vmem:[%s1506_s5 + $0x60] sm:$0xff] %vm898_vm2, %v883_v25 }
 0x2c4   : > { %v1124_v27 = vpop.f32.mrf.mxu1 }
 0x2c5   : > { %914 = vst.msk [vmem:[%s1506_s5 + $0x78] sm:$0xff] %vm898_vm2, %v1124_v27 }
 0x2c6   : > { %v886_v29 = vpop.f32.mrf.mxu1 }
 0x2c7   : > { %912 = vst.msk [vmem:[%s1506_s5 + $0x68] sm:$0xff] %vm898_vm2, %v886_v29 }
 0x2c8 PF: > { %s15_s20 = sadd.s32 1, %s1184_s20   ;;  %s1507_s18 = smov %s1180_s19 }
 0x2c9   : > { %p12_p7 = scmp.ge.s32.totalorder %s15_s20, 5   ;;  %s1508_s19 = smov %s1510_s21 }
 0x2cb   :  { %14 = sbr.rel (!%p12_p7) target bundleno = 2 (0x2), region = 89 }

// kernel: _device_forward.4
= control target key start
LH: loop header
LB: loop body
LE: loop exit
PB: predicated region body
PF: predicated region fallthrough
CT: control target
= control target key end

     0   :  { %vm111_vm0 = vcmask 1043456   ;;  %vm86_vm1 = vcmask 64512   ;;  %vm236_vm2 = vcmask 261120   ;;  %s1041_s3 = inlined_call_operand.vmem [shape: f32[8,32], index: 3, kind: input, shape index: {}]   ;;  %s1042_s0 = inlined_call_operand.vmem [shape: bf16[128,8], index: 0, kind: input, shape index: {}]   ;;  %s1043_s1 = inlined_call_operand.vmem [shape: bf16[32,128], index: 1, kind: input, shape index: {}]   ;;  %s1044_s4 = inlined_call_operand.vmem [shape: f32[1,32], index: 4, kind: input, shape index: {}]   ;;  %s1045_s2 = inlined_call_operand.vmem [shape: bf16[128,128], index: 2, kind: input, shape index: {}]   ;;  %s1046_s5 = inlined_call_operand.vmem [shape: bf16[128,128], index: 5, kind: output, shape index: {}]  }
   0x1   :  { %v37_v0 = vld [vmem:[%s1041_s3] sm:$0xff]  ;;  %v838_v4 = vld [vmem:[%s1042_s0 + $0x8] sm:$0xff]   ;;  %v839_v5 = vld [vmem:[%s1042_s0 + $0x10] sm:$0xff]  }
   0x2   :  { %v38_v1 = vpack.c.bf16 %v37_v0, %v37_v0  ;;  %v837_v2 = vld [vmem:[%s1042_s0] sm:$0xff]   ;;  %v840_v6 = vld [vmem:[%s1042_s0 + $0x18] sm:$0xff]   ;;  %v842_v8 = vld [vmem:[%s1042_s0 + $0x28] sm:$0xff]  }
   0x3   :  { %800 = vmatprep.mubr.msk.bf16.mxu0 %vm86_vm1, %v837_v2  ;;  %v841_v7 = vld [vmem:[%s1042_s0 + $0x20] sm:$0xff]   ;;  %v843_v9 = vld [vmem:[%s1042_s0 + $0x30] sm:$0xff]   ;;  %v844_v10 = vld [vmem:[%s1042_s0 + $0x38] sm:$0xff]  }
   0x4   :  { %836 = vmatprep.subr.msk.bf16.mxu0 %vm111_vm0, %v38_v1  ;;  %v113_v3 = vsel %vm111_vm0, %v38_v1, 0  ;;  %v845_v11 = vld [vmem:[%s1043_s1 + $0x8] sm:$0xff]   ;;  %v846_v12 = vld [vmem:[%s1043_s1] sm:$0xff]  }
   0x5   :  { %799 = vmatpush3.bf16.msra.mxu0 %v113_v3  ;;  %816 = vmatprep.subr.bf16.mxu1 %v845_v11  ;;  %v618_v16 = vld [vmem:[%s1044_s4] ss:$0 sm:$0xff] }
   0x6   :  { %817 = vmatpush3.bf16.msra.mxu1 %v845_v11 }
   0x7   :  { %818 = vmatprep.subr.bf16.mxu1 %v846_v12 }
   0x8   :  { %801 = vmatmul.mubr.msk.bf16.vlgmr.msra.gmra.mxu0 %vm86_vm1, %v838_v4 }
   0x9   :  { %804 = vmatprep.mubr.msk.bf16.mxu0 %vm86_vm1, %v839_v5 }
   0xa   :  { %819 = vmatpush3.bf16.msra.mxu1 %v846_v12 }
  0x10   :  { %805 = vmatmul.mubr.msk.bf16.gmra.mxu0 %vm86_vm1, %v840_v6 }
  0x11   :  { %808 = vmatprep.mubr.msk.bf16.mxu0 %vm86_vm1, %v841_v7 }
  0x18   :  { %809 = vmatmul.mubr.msk.bf16.gmra.mxu0 %vm86_vm1, %v842_v8 }
  0x19   :  { %812 = vmatprep.mubr.msk.bf16.mxu0 %vm86_vm1, %v843_v9 }
  0x20   :  { %813 = vmatmul.mubr.msk.bf16.gmra.mxu0 %vm86_vm1, %v844_v10 }
  0xc8   :  { %v802_v13 = vpop.f32.mrf.mxu0 }
  0xc9   :  { %v158_v21 = vadd.f32 %v802_v13, %v618_v16 }
  0xca   :  { %v149_v14 = vpop.f32.mrf.mxu0 }
  0xcb   :  { %v150_v19 = vadd.f32 %v618_v16, %v149_v14 }
  0xcc   :  { %v803_v15 = vpop.f32.mrf.mxu0 }
  0xcd   :  { %v161_v17 = vadd.f32 %v803_v15, %v618_v16 }
  0xce   :  { %v152_v18 = vpop.f32.mrf.mxu0 }
  0xcf   :  { %v153_v20 = vadd.f32 %v618_v16, %v152_v18  ;;  %v213_v24 = vpack.c.bf16 %v161_v17, %v158_v21 }
  0xd0   :  { %v806_v22 = vpop.f32.mrf.mxu0 }
  0xd1   :  { %v212_v23 = vpack.c.bf16 %v153_v20, %v150_v19  ;;  %v174_v31 = vadd.f32 %v806_v22, %v618_v16 }
  0xd2   :  { %v165_v25 = vpop.f32.mrf.mxu0 }
  0xd3   :  { %820 = vmatprep.mubr.msk.bf16.mxu1 %vm236_vm2, %v212_v23  ;;  %v166_v29 = vadd.f32 %v618_v16, %v165_v25 }
  0xd4   :  { %v807_v26 = vpop.f32.mrf.mxu0  ;;  %821 = vmatmul.mubr.msk.bf16.vlgmr.msra.gmra.mxu1 %vm236_vm2, %v213_v24 }
  0xd5   :  { %v177_v27 = vadd.f32 %v807_v26, %v618_v16 }
  0xd6   :  { %v168_v28 = vpop.f32.mrf.mxu0 }
  0xd7   :  { %v169_v30 = vadd.f32 %v618_v16, %v168_v28  ;;  %v215_v34 = vpack.c.bf16 %v177_v27, %v174_v31 }
  0xd8   :  { %v810_v32 = vpop.f32.mrf.mxu0 }
  0xd9   :  { %v214_v33 = vpack.c.bf16 %v169_v30, %v166_v29  ;;  %v190_v41 = vadd.f32 %v810_v32, %v618_v16 }
  0xda   :  { %v181_v35 = vpop.f32.mrf.mxu0 }
  0xdb   :  { %824 = vmatprep.mubr.msk.bf16.mxu1 %vm236_vm2, %v214_v33  ;;  %v182_v39 = vadd.f32 %v618_v16, %v181_v35 }
  0xdc   :  { %v811_v36 = vpop.f32.mrf.mxu0  ;;  %825 = vmatmul.mubr.msk.bf16.gmra.mxu1 %vm236_vm2, %v215_v34 }
  0xdd   :  { %v193_v37 = vadd.f32 %v811_v36, %v618_v16 }
  0xde   :  { %v184_v38 = vpop.f32.mrf.mxu0 }
  0xdf   :  { %v185_v40 = vadd.f32 %v618_v16, %v184_v38  ;;  %v217_v44 = vpack.c.bf16 %v193_v37, %v190_v41 }
  0xe0   :  { %v814_v42 = vpop.f32.mrf.mxu0 }
  0xe1   :  { %v216_v43 = vpack.c.bf16 %v185_v40, %v182_v39  ;;  %v206_v51 = vadd.f32 %v814_v42, %v618_v16 }
  0xe2   :  { %v197_v45 = vpop.f32.mrf.mxu0 }
  0xe3   :  { %828 = vmatprep.mubr.msk.bf16.mxu1 %vm236_vm2, %v216_v43  ;;  %v198_v49 = vadd.f32 %v618_v16, %v197_v45 }
  0xe4   :  { %v815_v46 = vpop.f32.mrf.mxu0  ;;  %829 = vmatmul.mubr.msk.bf16.gmra.mxu1 %vm236_vm2, %v217_v44 }
  0xe5   :  { %v209_v47 = vadd.f32 %v815_v46, %v618_v16 }
  0xe6   :  { %v200_v48 = vpop.f32.mrf.mxu0 }
  0xe7   :  { %v201_v50 = vadd.f32 %v618_v16, %v200_v48  ;;  %v219_v53 = vpack.c.bf16 %v209_v47, %v206_v51 }
  0xe9   :  { %v218_v52 = vpack.c.bf16 %v201_v50, %v198_v49 }
  0xeb   :  { %832 = vmatprep.mubr.msk.bf16.mxu1 %vm236_vm2, %v218_v52 }
  0xec   :  { %833 = vmatmul.mubr.msk.bf16.gmra.mxu1 %vm236_vm2, %v219_v53 }
 0x194   :  { %v822_v54 = vpop.f32.mrf.mxu1 }
 0x195   :  { %v360_v55 = vmul.f32 0.17677669, %v822_v54 }
 0x196   :  { %v295_v56 = vpop.f32.mrf.mxu1 }
 0x197   :  { %v647_v57 = vclamps-f32 %v360_v55, 30.0  ;;  %v358_v58 = vmul.f32 0.17677669, %v295_v56 }
 0x198   :  { %v823_v59 = vpop.f32.mrf.mxu1 }
 0x199   :  { %v408_v60 = vsub.f32 0.0, %v647_v57  ;;  %v645_v61 = vclamps-f32 %v358_v58, 30.0  ;;  %v361_v62 = vmul.f32 0.17677669, %v823_v59 }
 0x19a   :  { %v298_v63 = vpop.f32.mrf.mxu1 }
 0x19b   :  { %v426_v0 = vmul.f32 1.442695, %v408_v60  ;;  %v406_v1 = vsub.f32 0.0, %v645_v61  ;;  %v648_v2 = vclamps-f32 %v361_v62, 30.0  ;;  %v359_v3 = vmul.f32 0.17677669, %v298_v63 }
 0x19c   :  { %v826_v4 = vpop.f32.mrf.mxu1 }
 0x19d   :  { %847 = vpow2.f32 %v426_v0  ;;  %v422_v5 = vmul.f32 1.442695, %v406_v1  ;;  %v409_v6 = vsub.f32 0.0, %v648_v2  ;;  %v646_v7 = vclamps-f32 %v359_v3, 30.0 }
 0x19e   :  { %v364_v8 = vmul.f32 0.17677669, %v826_v4  ;;  %v311_v9 = vpop.f32.mrf.mxu1 }
 0x19f   :  { %849 = vpow2.f32 %v422_v5  ;;  %v428_v10 = vmul.f32 1.442695, %v409_v6  ;;  %v407_v11 = vsub.f32 0.0, %v646_v7  ;;  %v362_v12 = vmul.f32 0.17677669, %v311_v9 }
 0x1a0   :  { %v651_v13 = vclamps-f32 %v364_v8, 30.0  ;;  %v827_v14 = vpop.f32.mrf.mxu1 }
 0x1a1   :  { %851 = vpow2.f32 %v428_v10  ;;  %v424_v15 = vmul.f32 1.442695, %v407_v11  ;;  %v649_v16 = vclamps-f32 %v362_v12, 30.0  ;;  %v365_v17 = vmul.f32 0.17677669, %v827_v14 }
 0x1a2   :  { %v412_v18 = vsub.f32 0.0, %v651_v13  ;;  %v314_v19 = vpop.f32.mrf.mxu1 }
 0x1a3   :  { %853 = vpow2.f32 %v424_v15  ;;  %v410_v20 = vsub.f32 0.0, %v649_v16  ;;  %v652_v21 = vclamps-f32 %v365_v17, 30.0  ;;  %v363_v22 = vmul.f32 0.17677669, %v314_v19 }
 0x1a4   :  { %v434_v23 = vmul.f32 1.442695, %v412_v18  ;;  %v830_v24 = vpop.f32.mrf.mxu1 }
 0x1a5   :  { %v430_v25 = vmul.f32 1.442695, %v410_v20  ;;  %v413_v26 = vsub.f32 0.0, %v652_v21  ;;  %v650_v27 = vclamps-f32 %v363_v22, 30.0  ;;  %v368_v28 = vmul.f32 0.17677669, %v830_v24 }
 0x1a6   :  { %855 = vpow2.f32 %v434_v23  ;;  %v327_v29 = vpop.f32.mrf.mxu1  ;;  %v765_v20 = vld [vmem:[%s1045_s2 + $0x8] sm:$0xff]   ;;  %v694_v24 = vld [vmem:[%s1045_s2] sm:$0xff]  }
 0x1a7   :  { %857 = vpow2.f32 %v430_v25  ;;  %v436_v30 = vmul.f32 1.442695, %v413_v26  ;;  %v411_v31 = vsub.f32 0.0, %v650_v27  ;;  %v655_v32 = vclamps-f32 %v368_v28, 30.0 }
 0x1a8   :  { %v366_v33 = vmul.f32 0.17677669, %v327_v29  ;;  %v831_v34 = vpop.f32.mrf.mxu1  ;;  %v699_v26 = vunpack.c.l.bf16 %v765_v20  ;;  %v700_v27 = vunpack.c.h.bf16 %v765_v20 }
 0x1a9   :  { %859 = vpow2.f32 %v436_v30  ;;  %v432_v35 = vmul.f32 1.442695, %v411_v31  ;;  %v416_v36 = vsub.f32 0.0, %v655_v32  ;;  %v369_v37 = vmul.f32 0.17677669, %v831_v34 }
 0x1aa   :  { %v848_v38 = vpop.eup %847  ;;  %v653_v39 = vclamps-f32 %v366_v33, 30.0  ;;  %v330_v40 = vpop.f32.mrf.mxu1  ;;  %v695_v31 = vunpack.c.l.bf16 %v694_v24  ;;  %v696_v32 = vunpack.c.h.bf16 %v694_v24 }
 0x1ab   :  { %v456_v41 = vadd.f32 1.0, %v848_v38  ;;  %861 = vpow2.f32 %v432_v35  ;;  %v442_v42 = vmul.f32 1.442695, %v416_v36  ;;  %v656_v43 = vclamps-f32 %v369_v37, 30.0 }
 0x1ac   :  { %v850_v44 = vpop.eup %849  ;;  %v414_v45 = vsub.f32 0.0, %v653_v39  ;;  %v367_v46 = vmul.f32 0.17677669, %v330_v40  ;;  %v834_v47 = vpop.f32.mrf.mxu1  ;;  %v767_v39 = vld [vmem:[%s1045_s2 + $0x18] sm:$0xff]  }
 0x1ad   :  { %863 = vrcp.f32 %v456_v41  ;;  %v454_v48 = vadd.f32 1.0, %v850_v44  ;;  %v417_v49 = vsub.f32 0.0, %v656_v43  ;;  %v372_v50 = vmul.f32 0.17677669, %v834_v47 }
 0x1ae   :  { %v852_v51 = vpop.eup %851  ;;  %865 = vpow2.f32 %v442_v42  ;;  %v438_v52 = vmul.f32 1.442695, %v414_v45  ;;  %v654_v53 = vclamps-f32 %v367_v46, 30.0  ;;  %v343_v54 = vpop.f32.mrf.mxu1  ;;  %v766_v46 = vld [vmem:[%s1045_s2 + $0x10] sm:$0xff]  }
 0x1af   :  { %867 = vrcp.f32 %v454_v48  ;;  %v457_v55 = vadd.f32 1.0, %v852_v51  ;;  %v444_v56 = vmul.f32 1.442695, %v417_v49  ;;  %v659_v57 = vclamps-f32 %v372_v50, 30.0 }
 0x1b0   :  { %v854_v58 = vpop.eup %853  ;;  %869 = vpow2.f32 %v438_v52  ;;  %v415_v59 = vsub.f32 0.0, %v654_v53  ;;  %v370_v60 = vmul.f32 0.17677669, %v343_v54  ;;  %v835_v61 = vpop.f32.mrf.mxu1  ;;  %v707_v50 = vunpack.c.l.bf16 %v767_v39 }
 0x1b1   :  { %871 = vrcp.f32 %v457_v55  ;;  %v455_v62 = vadd.f32 1.0, %v854_v58  ;;  %v420_v63 = vsub.f32 0.0, %v659_v57  ;;  %v373_v0 = vmul.f32 0.17677669, %v835_v61 }
 0x1b2   :  { %873 = vpow2.f32 %v444_v56  ;;  %v440_v1 = vmul.f32 1.442695, %v415_v59  ;;  %v657_v2 = vclamps-f32 %v370_v60, 30.0  ;;  %v346_v3 = vpop.f32.mrf.mxu1  ;;  %v708_v51 = vunpack.c.h.bf16 %v767_v39 }
 0x1b3   :  { %v856_v4 = vpop.eup %855  ;;  %875 = vrcp.f32 %v455_v62  ;;  %v450_v5 = vmul.f32 1.442695, %v420_v63  ;;  %v660_v6 = vclamps-f32 %v373_v0, 30.0  ;;  %v371_v7 = vmul.f32 0.17677669, %v346_v3 }
 0x1b4   :  { %v858_v8 = vpop.eup %857  ;;  %v460_v9 = vadd.f32 1.0, %v856_v4  ;;  %877 = vpow2.f32 %v440_v1  ;;  %v418_v10 = vsub.f32 0.0, %v657_v2  ;;  %v703_v55 = vunpack.c.l.bf16 %v766_v46  ;;  %v769_v4 = vld [vmem:[%s1045_s2 + $0x28] sm:$0xff]  }
 0x1b5   :  { %v458_v11 = vadd.f32 1.0, %v858_v8  ;;  %879 = vpow2.f32 %v450_v5  ;;  %v421_v12 = vsub.f32 0.0, %v660_v6  ;;  %v658_v13 = vclamps-f32 %v371_v7, 30.0  ;;  %v768_v7 = vld [vmem:[%s1045_s2 + $0x20] sm:$0xff]  }
 0x1b6   :  { %v860_v14 = vpop.eup %859  ;;  %881 = vrcp.f32 %v460_v9  ;;  %v446_v15 = vmul.f32 1.442695, %v418_v10  ;;  %v704_v56 = vunpack.c.h.bf16 %v766_v46  ;;  %v715_v8 = vunpack.c.l.bf16 %v769_v4 }
 0x1b7   :  { %883 = vrcp.f32 %v458_v11  ;;  %v461_v16 = vadd.f32 1.0, %v860_v14  ;;  %v452_v17 = vmul.f32 1.442695, %v421_v12  ;;  %v419_v18 = vsub.f32 0.0, %v658_v13 }
 0x1b8   :  { %v862_v19 = vpop.eup %861  ;;  %885 = vpow2.f32 %v446_v15  ;;  %v716_v9 = vunpack.c.h.bf16 %v769_v4  ;;  %v711_v12 = vunpack.c.l.bf16 %v768_v7  ;;  %v712_v13 = vunpack.c.h.bf16 %v768_v7 }
 0x1b9   :  { %887 = vrcp.f32 %v461_v16  ;;  %v459_v21 = vadd.f32 1.0, %v862_v19  ;;  %v448_v22 = vmul.f32 1.442695, %v419_v18  ;;  %v771_v18 = vld [vmem:[%s1045_s2 + $0x38] sm:$0xff]  }
 0x1ba   :  { %v864_v23 = vpop.eup %863  ;;  %889 = vpow2.f32 %v452_v17  ;;  %v723_v24 = vunpack.c.l.bf16 %v771_v18 }
 0x1bb   :  { %v866_v25 = vpop.eup %865  ;;  %891 = vrcp.f32 %v459_v21  ;;  %v520_v36 = vmul.f32 %v864_v23, %v699_v26 }
 0x1bc   :  { %v868_v28 = vpop.eup %867  ;;  %v464_v29 = vadd.f32 1.0, %v866_v25  ;;  %893 = vpow2.f32 %v448_v22  ;;  %v770_v22 = vld [vmem:[%s1045_s2 + $0x30] sm:$0xff]   ;;  %v724_v25 = vunpack.c.h.bf16 %v771_v18 }
 0x1bd   :  { %v870_v30 = vpop.eup %869  ;;  %v518_v42 = vmul.f32 %v868_v28, %v695_v31  ;;  %v719_v28 = vunpack.c.l.bf16 %v770_v22 }
 0x1be   :  { %v872_v33 = vpop.eup %871  ;;  %v462_v34 = vadd.f32 1.0, %v870_v30  ;;  %895 = vrcp.f32 %v464_v29  ;;  %v720_v29 = vunpack.c.h.bf16 %v770_v22 }
 0x1bf   :  { %v874_v35 = vpop.eup %873  ;;  %v521_v37 = vmul.f32 %v872_v33, %v700_v27 }
 0x1c0   :  { %v876_v38 = vpop.eup %875  ;;  %v465_v40 = vadd.f32 1.0, %v874_v35  ;;  %897 = vrcp.f32 %v462_v34 }
 0x1c1   :  { %v878_v41 = vpop.eup %877  ;;  %v733_v43 = vpack.c.bf16 %v521_v37, %v520_v36  ;;  %v519_v44 = vmul.f32 %v876_v38, %v696_v32 }
 0x1c2   :  { %v880_v45 = vpop.eup %879  ;;  %899 = vrcp.f32 %v465_v40  ;;  %v463_v47 = vadd.f32 1.0, %v878_v41 }
 0x1c3   :  { %v882_v48 = vpop.eup %881  ;;  %772 = vst [vmem:[%s1046_s5 + $0x8] sm:$0xff] %v733_v43   ;;  %v728_v49 = vpack.c.bf16 %v519_v44, %v518_v42  ;;  %v468_v53 = vadd.f32 1.0, %v880_v45 }
 0x1c4   :  { %v884_v52 = vpop.eup %883  ;;  %901 = vrcp.f32 %v463_v47  ;;  %v524_v60 = vmul.f32 %v882_v48, %v707_v50 }
 0x1c5   :  { %v886_v54 = vpop.eup %885  ;;  %729 = vst [vmem:[%s1046_s5] sm:$0xff] %v728_v49   ;;  %903 = vrcp.f32 %v468_v53  ;;  %v522_v1 = vmul.f32 %v884_v52, %v703_v55 }
 0x1c6   :  { %v888_v57 = vpop.eup %887  ;;  %v466_v58 = vadd.f32 1.0, %v886_v54 }
 0x1c7   :  { %v890_v59 = vpop.eup %889  ;;  %v525_v61 = vmul.f32 %v888_v57, %v708_v51 }
 0x1c8   :  { %v892_v62 = vpop.eup %891  ;;  %v469_v63 = vadd.f32 1.0, %v890_v59  ;;  %905 = vrcp.f32 %v466_v58 }
 0x1c9   :  { %v894_v0 = vpop.eup %893  ;;  %v743_v2 = vpack.c.bf16 %v525_v61, %v524_v60  ;;  %v523_v3 = vmul.f32 %v892_v62, %v704_v56 }
 0x1ca   :  { %907 = vrcp.f32 %v469_v63  ;;  %v467_v5 = vadd.f32 1.0, %v894_v0 }
 0x1cb   :  { %774 = vst [vmem:[%s1046_s5 + $0x18] sm:$0xff] %v743_v2   ;;  %v738_v6 = vpack.c.bf16 %v523_v3, %v522_v1  ;;  %v896_v10 = vpop.eup %895 }
 0x1cc   :  { %909 = vrcp.f32 %v467_v5  ;;  %v528_v15 = vmul.f32 %v896_v10, %v715_v8 }
 0x1cd   :  { %773 = vst [vmem:[%s1046_s5 + $0x10] sm:$0xff] %v738_v6   ;;  %v898_v11 = vpop.eup %897 }
 0x1ce   :  { %v526_v19 = vmul.f32 %v898_v11, %v711_v12 }
 0x1cf   :  { %v900_v14 = vpop.eup %899 }
 0x1d0   :  { %v529_v16 = vmul.f32 %v900_v14, %v716_v9 }
 0x1d1   :  { %v902_v17 = vpop.eup %901 }
 0x1d2   :  { %v753_v20 = vpack.c.bf16 %v529_v16, %v528_v15  ;;  %v527_v21 = vmul.f32 %v902_v17, %v712_v13  ;;  %v904_v26 = vpop.eup %903 }
 0x1d3   :  { %v532_v31 = vmul.f32 %v904_v26, %v723_v24 }
 0x1d4   :  { %776 = vst [vmem:[%s1046_s5 + $0x28] sm:$0xff] %v753_v20   ;;  %v748_v23 = vpack.c.bf16 %v527_v21, %v526_v19 }
 0x1d5   :  { %v906_v27 = vpop.eup %905 }
 0x1d6   :  { %775 = vst [vmem:[%s1046_s5 + $0x20] sm:$0xff] %v748_v23   ;;  %v530_v34 = vmul.f32 %v906_v27, %v719_v28 }
 0x1d7   :  { %v908_v30 = vpop.eup %907 }
 0x1d8   :  { %v533_v32 = vmul.f32 %v908_v30, %v724_v25 }
 0x1d9   :  { %v910_v33 = vpop.eup %909 }
 0x1da   :  { %v763_v35 = vpack.c.bf16 %v533_v32, %v532_v31  ;;  %v531_v36 = vmul.f32 %v910_v33, %v720_v29 }
 0x1dc   :  { %778 = vst [vmem:[%s1046_s5 + $0x38] sm:$0xff] %v763_v35   ;;  %v758_v37 = vpack.c.bf16 %v531_v36, %v530_v34 }
 0x1de   :  { %777 = vst [vmem:[%s1046_s5 + $0x30] sm:$0xff] %v758_v37  }

// kernel: _device_forward.5
= control target key start
LH: loop header
LB: loop body
LE: loop exit
PB: predicated region body
PF: predicated region fallthrough
CT: control target
= control target key end

     0   :  { %s885_s0 = inlined_call_operand.vmem [shape: bf16[16,896], index: 0, kind: input, shape index: {}]   ;;  %s886_s1 = inlined_call_operand.vmem [shape: f32[32,16], index: 1, kind: input, shape index: {}]   ;;  %s887_s2 = inlined_call_operand.vmem [shape: f32[32,1], index: 2, kind: input, shape index: {}]   ;;  %s888_s3 = inlined_call_operand.vmem [shape: f32[32,32], index: 3, kind: input, shape index: {}]   ;;  %s889_s4 = inlined_call_operand.vmem [shape: f32[32,1], index: 4, kind: input, shape index: {}]   ;;  %s890_s5 = inlined_call_operand.vmem [shape: f32[8,32], index: 5, kind: input, shape index: {}]   ;;  %s891_s6 = inlined_call_operand.<no memory space> [shape: f32[1,1], index: 6, kind: input, shape index: {}]   ;;  %s892_s7 = inlined_call_operand.vmem [shape: f32[1,896], index: 7, kind: output, shape index: {}]  }
   0x1   :  { %v12_v0 = vstv %s891_s6 }
   0x2   :  { %13 = vst [vmem:[#allocation2] sm:$0x1] %v12_v0 }
   0x3   :  { %s775_s26 = smov 0   ;;  %s777_s27 = smov 0  }
   0x4   :  { %s779_s28 = smov 0  }
   0x5 LB: > { %s627_s6 = sadd.s32 4294967295, %s727_s28   ;;  %s792_s29 = sadd.s32 1, %s727_s28   ;;  %s727_s28 = sphi %s779_s28, %s895_s28   ;;  %s723_s27 = sphi %s777_s27, %s894_s27   ;;  %s719_s26 = sphi %s775_s26, %s893_s26  }
   0x6   : > { %s23_s30 = ssub.s32 %s727_s28, %s792_s29  ;;  %s26_s8 = sadd.s32 1, %s723_s27 }
   0x7   : > { %p24_p0 = scmp.eq.s32.totalorder %s23_s30, 0  ;;  %p33_p1 = scmp.ne.s32.totalorder %s723_s27, %s719_s26 }
   0x8   : > { %p34_p2 = scmp.eq.s32.totalorder %s727_s28, 0  ;;  %p630_p4 = scmp.ge.s32.totalorder %s727_s28, 7 }
   0x9   : > { %s801_s9 = scalar_select %p24_p0, %s723_s27, %s26_s8  }
   0xa   : > { %p35_p3 = por %p34_p2, %p33_p1  ;;  %229 = sbr.rel (%p630_p4) target bundleno = 20 (0x14), region = 40 }
   0xf   : > { %232 = sbr.rel (!%p35_p3) target bundleno = 20 (0x14), region = 44  ;;  %s234_s10 = sand.u32 (%p35_p3), 1, %s723_s27  }
  0x10   : > { %s632_s11 = sshll.u32 (%p35_p3), %s727_s28, 2  ;;  %s631_s12 = sshll.u32 (%p35_p3), %s234_s10, 3 }
  0x11   : > { %s238_s15 = scalar_lea.vmem (%p35_p3), %s885_s0, %s632_s11  ;;  %s236_s16 = scalar_lea.vmem (%p35_p3), [#allocation3], %s631_s12 }
  0x12   : > { %v255_v1 = vld [vmem:[%s238_s15] sm:$0xf] (%p35_p3)  ;;  %v257_v2 = vld [vmem:[%s238_s15 + $0x1c] sm:$0xf] (%p35_p3) }
  0x13   : > { %256 = vst [vmem:[%s236_s16] sm:$0xf] (%p35_p3), %v255_v1  ;;  %258 = vst [vmem:[%s236_s16 + $0x4] sm:$0xf] (%p35_p3), %v257_v2 }
  0x14 PF: > { %p633_p5 = scmp.ge.s32.totalorder %s727_s28, 1  ;;  %p285_p6 = scmp.lt.s32.totalorder %s727_s28, 8 }
  0x16   : > { %p286_p7 = pnand %p633_p5, %p285_p6 }
  0x17   : > { %s292_s17 = sand.u32 (!%p286_p7), 1, %s719_s26   ;;  %p321_p8 = scmp.lt.s32.totalorder (!%p286_p7), %s627_s6, 6 }
  0x18   : > { %289 = sbr.rel (%p286_p7) target bundleno = 656 (0x290), region = 85  ;;  %s634_s22 = sshll.u32 (!%p286_p7), %s292_s17, 3 }
  0x19   : > { %s294_s14 = scalar_lea.vmem (!%p286_p7), [#allocation3], %s634_s22 }
  0x1d   : > { %v327_v3 = vld [vmem:[%s886_s1] sm:$0xff]  ;;  %v328_v4 = vld [vmem:[%s886_s1 + $0x8] sm:$0xff]  ;;  %vm363_vm0 = vcmask 130048   ;;  %v329_v6 = vld [vmem:[%s886_s1 + $0x10] sm:$0xff]  ;;  %v729_v7 = vmov 0   ;;  %vm455_vm1 = vcmask 261120   ;;  %v568_v1 = vlaneseq }
  0x1e   : > { %v331_v5 = vpack.c.bf16 %v328_v4, %v327_v3  ;;  %702 = vset.pattern.permute.xlu0 %v729_v7  ;;  %v335_v8 = vld [vmem:[%s887_s2 + $0x10] sm:$0xff]  ;;  %703 = vset.pattern.permute.xlu1 %v729_v7  ;;  %v330_v9 = vld [vmem:[%s886_s1 + $0x18] sm:$0xff]  ;;  %v333_v11 = vld [vmem:[%s887_s2] sm:$0xff]  ;;  %v730_v44 = vmov 0.0   ;;  %vm731_vm2 = vmmov 0   ;;  %s897_s6 = smov (!%p321_p8, %s627_s6), 6 }
  0x1f   : > { %349 = vperm.xlu0 %702, %v335_v8   ;;  %v336_v10 = vld [vmem:[%s887_s2 + $0x18] sm:$0xff]  ;;  %v704_v12 = vld [vmem:[%s294_s14] sm:$0xff]   ;;  %339 = vperm.xlu1 %703, %v333_v11   ;;  %v332_v14 = vpack.c.bf16 %v330_v9, %v329_v6  ;;  %v562_v19 = vld [vmem:[#allocation2] sm:$0x1]  ;;  %v569_v2 = vshrl.u32 %v568_v1, 7  ;;  %s323_s18 = scalar_lea.vmem %s892_s7, %s897_s6 }
  0x20   : > { %655 = vmatprep.mubr.msk.bf16.mxu0 %vm363_vm0, %v331_v5  ;;  %v334_v13 = vld [vmem:[%s887_s2 + $0x8] sm:$0xff]  ;;  %653 = vmatprep.subr.bf16.mxu0 %v704_v12  ;;  %v433_v15 = vld [vmem:[%s889_s4 + $0x10] sm:$0xff]  ;;  %v434_v16 = vld [vmem:[%s889_s4 + $0x18] sm:$0xff] }
  0x21   : > { %654 = vmatpush3.bf16.msra.mxu0 %v704_v12  ;;  %v431_v17 = vld [vmem:[%s889_s4] sm:$0xff]  ;;  %v432_v18 = vld [vmem:[%s889_s4 + $0x8] sm:$0xff]  ;;  %v425_v41 = vld [vmem:[%s888_s3 + $0x10] sm:$0xff]  ;;  %v570_v3 = vsub.s32 0, %v569_v2 }
  0x22   : > { %v423_v20 = vld [vmem:[%s888_s3] sm:$0xff]  ;;  %v424_v21 = vld [vmem:[%s888_s3 + $0x8] sm:$0xff]  ;;  %v426_v42 = vld [vmem:[%s888_s3 + $0x18] sm:$0xff]  ;;  %667 = vmatprep.subr.bf16.mxu0 %v730_v44 }
  0x23   : > { %354 = vperm.xlu0 %702, %v336_v10   ;;  %344 = vperm.xlu1 %703, %v334_v13   ;;  %v427_v22 = vpack.c.bf16 %v424_v21, %v423_v20  ;;  %v428_v43 = vpack.c.bf16 %v426_v42, %v425_v41  ;;  %v515_v62 = vld [vmem:[%s890_s5] sm:$0xff] }
  0x24   : > { %656 = vmatmul.mubr.msk.bf16.vlgmr.msra.gmra.mxu0 %vm363_vm0, %v332_v14  ;;  %v516_v0 = vpack.c.bf16 %v515_v62, %v515_v62 }
  0x25   : > { %663 = vmatprep.mubr.msk.bf16.mxu1 %vm455_vm1, %v427_v22  ;;  %671 = vmatprep.mubr.msk.bf16.mxu0 %vm731_vm2, %v730_v44 }
  0x27   : > { %447 = vperm.xlu0 %702, %v433_v15   ;;  %452 = vperm.xlu1 %703, %v434_v16  }
  0x2b   : > { %437 = vperm.xlu0 %702, %v431_v17   ;;  %442 = vperm.xlu1 %703, %v432_v18  }
  0x2f   : > { %565 = vperm.xlu0 %702, %v562_v19  }
  0x9a   : > { %v350_v23 = vpop.permute.xlu0 %349  ;;  %v340_v24 = vpop.permute.xlu1 %339 }
  0x9e   : > { %v355_v28 = vpop.permute.xlu0 %354  ;;  %v345_v32 = vpop.permute.xlu1 %344 }
  0xa2   : > { %v448_v45 = vpop.permute.xlu0 %447  ;;  %v453_v46 = vpop.permute.xlu1 %452 }
  0xa6   : > { %v438_v51 = vpop.permute.xlu0 %437  ;;  %v443_v53 = vpop.permute.xlu1 %442 }
  0xaa   : > { %v566_v4 = vpop.permute.xlu0 %565 }
  0xab   : > { %v571_v5 = vrot.slane %v566_v4, %v570_v3 }
  0xe4   : > { %v657_v25 = vpop.f32.mrf.mxu0 }
  0xe5   : > { %v413_v27 = vadd.f32 %v657_v25, %v350_v23 }
  0xe6   : > { %v404_v26 = vpop.f32.mrf.mxu0 }
  0xe7   : > { %v405_v30 = vadd.f32 %v404_v26, %v340_v24  ;;  %v421_v34 = vmax.f32 %v413_v27, 0.0 }
  0xe8   : > { %v658_v29 = vpop.f32.mrf.mxu0 }
  0xe9   : > { %v416_v31 = vadd.f32 %v658_v29, %v355_v28  ;;  %v419_v37 = vmax.f32 %v405_v30, 0.0 }
  0xea   : > { %v407_v33 = vpop.f32.mrf.mxu0 }
  0xeb   : > { %v422_v35 = vmax.f32 %v416_v31, 0.0  ;;  %v408_v36 = vadd.f32 %v407_v33, %v345_v32 }
  0xed   : > { %v420_v38 = vmax.f32 %v408_v36, 0.0  ;;  %v430_v39 = vpack.c.bf16 %v422_v35, %v421_v34 }
  0xef   : > { %v429_v40 = vpack.c.bf16 %v420_v38, %v419_v37  ;;  %659 = vmatprep.subr.bf16.mxu1 %v430_v39 }
  0xf0   : > { %660 = vmatpush3.bf16.msra.mxu1 %v430_v39 }
  0xf1   : > { %661 = vmatprep.subr.bf16.mxu1 %v429_v40 }
  0xf4   : > { %662 = vmatpush3.bf16.msra.mxu1 %v429_v40 }
  0xf7   : > { %664 = vmatmul.mubr.msk.bf16.vlgmr.msra.gmra.mxu1 %vm455_vm1, %v428_v43 }
 0x1b7   : > { %v665_v47 = vpop.f32.mrf.mxu1 }
 0x1b8   : > { %v505_v49 = vadd.f32 %v665_v47, %v448_v45 }
 0x1b9   : > { %v496_v48 = vpop.f32.mrf.mxu1 }
 0x1ba   : > { %v513_v55 = vmax.f32 %v505_v49, 0.0  ;;  %v497_v56 = vadd.f32 %v496_v48, %v438_v51 }
 0x1bb   : > { %v666_v50 = vpop.f32.mrf.mxu1 }
 0x1bc   : > { %v508_v52 = vadd.f32 %v666_v50, %v453_v46  ;;  %v511_v61 = vmax.f32 %v497_v56, 0.0 }
 0x1bd   : > { %v499_v54 = vpop.f32.mrf.mxu1 }
 0x1be   : > { %v514_v57 = vmax.f32 %v508_v52, 0.0  ;;  %v500_v58 = vadd.f32 %v499_v54, %v443_v53 }
 0x1c0   : > { %v518_v59 = vpack.c.bf16 %v514_v57, %v513_v55  ;;  %v512_v60 = vmax.f32 %v500_v58, 0.0 }
 0x1c2   : > { %668 = vmatpush3.bf16.msra.mxu0 %v518_v59  ;;  %v517_v63 = vpack.c.bf16 %v512_v60, %v511_v61 }
 0x1c3   : > { %669 = vmatprep.subr.bf16.mxu0 %v730_v44 }
 0x1c6   : > { %670 = vmatpush3.bf16.msra.mxu0 %v517_v63 }
 0x1c9   : > { %672 = vmatmul.mubr.msk.bf16.vlgmr.msra.gmra.mxu0 %vm455_vm1, %v516_v0 }
 0x289   : > { %v556_v6 = vpop.f32.mrf.mxu0 }
 0x28a   : > { %v572_v7 = vadd.f32 %v571_v5, %v556_v6 }
 0x28b   : > { %v673_v8 = vpop.f32.mrf.mxu0 }
 0x28c   : > { %573 = vst [vmem:[%s323_s18] sm:$0x1] %v572_v7 }
 0x28d   : > { %v559_v9 = vpop.f32.mrf.mxu0 }
 0x28f   : > { %v674_v10 = vpop.f32.mrf.mxu0 }
 0x290 PF: > { %p16_p9 = scmp.ge.s32.totalorder %s792_s29, 9   ;;  %s893_s26 = smov %s723_s27 }
 0x291   : > { %s894_s27 = smov %s801_s9  ;;  %s895_s28 = smov %s792_s29 }
 0x292   :  { %18 = sbr.rel (!%p16_p9) target bundleno = 5 (0x5), region = 124 }

</bundles_post_ra>
